<compile_context>
chip_gen: v7x
topology: tpu7x:2x2x1
jax: 0.10.0
libtpu: 0.0.40
codegen_flags: <defaults>
</compile_context>

<pallas_src>
import jax
import jax.numpy as jnp
from jax.experimental import pallas as pl
from jax.experimental.pallas import tpu as pltpu


def _autoencoder_kernel(x_ref,
                        w1, b1, w2, b2, w3, b3,   # encoder
                        w4, b4, w5, b5, w6, b6,   # decoder
                        o_ref):
    """Full encoder+decoder forward for one batch tile, all in VMEM."""

    def linear(h_bf16, w_ref, b_ref, relu):
        # MXU: bf16 x bf16 -> f32 accumulate.  Bias add / ReLU in f32 (VPU).
        y = jnp.dot(h_bf16, w_ref[...],
                    preferred_element_type=jnp.float32) + b_ref[...]
        if relu:
            y = jnp.maximum(y, 0.0)
        return y

    # Single cast to bf16 per layer input; activations chained in bf16 to keep
    # vreg pressure low on large batch tiles.
    h = x_ref[...].astype(jnp.bfloat16)
    # encoder: Linear -> ReLU -> Linear -> ReLU -> Linear
    h = linear(h, w1, b1, True).astype(jnp.bfloat16)
    h = linear(h, w2, b2, True).astype(jnp.bfloat16)
    h = linear(h, w3, b3, False).astype(jnp.bfloat16)
    # decoder: Linear -> ReLU -> Linear -> ReLU -> Linear
    h = linear(h, w4, b4, True).astype(jnp.bfloat16)
    h = linear(h, w5, b5, True).astype(jnp.bfloat16)
    y = linear(h, w6, b6, False)               # final layer left in f32
    o_ref[...] = y.astype(o_ref.dtype)


def _pick_batch_tile(B):
    """Largest tile that fills the MXU M dim and amortizes per-step overhead,
    while keeping >=2 grid steps when possible (megacore / pipelining)."""
    for t in (512, 256, 128, 64, 32, 16, 8):
        if B % t == 0 and B // t >= 2:
            return t
    return B               # tiny / odd batches: single grid step


def autoencoder_forward(x, params, *, batch_tile=None):
    """x: (B, input_dim). params: list of (W_t bf16 (in,out), b f32 (out,))."""
    B, input_dim = x.shape
    if batch_tile is None:
        batch_tile = _pick_batch_tile(B)

    # Pad the batch to a multiple of the tile (robustness for odd batches);
    # padded rows are zeros and sliced off afterwards.
    pad = (-B) % batch_tile
    if pad:
        x = jnp.pad(x, ((0, pad), (0, 0)))
    Bp = B + pad

    # Weights/biases: whole-array VMEM residents.  Their block never changes
    # across the grid, so they are loaded once (no per-step DMA, no double
    # buffering of the 12 constant operands).
    const_spec = pl.BlockSpec(memory_space=pltpu.MemorySpace.VMEM)
    wb_flat, wb_specs = [], []
    for (w_t, b) in params:
        wb_flat.extend([w_t, b.reshape(1, -1)])   # 2-D biases -> lane layout
        wb_specs.extend([const_spec, const_spec])

    grid = (Bp // batch_tile,)
    in_specs = [pl.BlockSpec((batch_tile, input_dim), lambda i: (i, 0))] + wb_specs
    out_spec = pl.BlockSpec((batch_tile, input_dim), lambda i: (i, 0))

    out = pl.pallas_call(
        _autoencoder_kernel,
        out_shape=jax.ShapeDtypeStruct((Bp, input_dim), x.dtype),
        grid_spec=pltpu.PrefetchScalarGridSpec(
            num_scalar_prefetch=0,
            grid=grid,
            in_specs=in_specs,
            out_specs=out_spec,
        ),
        compiler_params=pltpu.CompilerParams(
            dimension_semantics=("parallel",)),
    )(x, *wb_flat)

    return out[:B] if pad else out


def init_linear(key, in_features, out_features):
    """Deterministic init mimicking nn.Linear (uniform +/- 1/sqrt(fan_in)).
    Returns W pre-transposed to (in, out) and cast to bf16 for the MXU."""
    kw, kb = jax.random.split(key)
    bound = 1.0 / jnp.sqrt(jnp.float32(in_features))
    w_t = jax.random.uniform(kw, (in_features, out_features), jnp.float32,
                             minval=-bound, maxval=bound)
    b = jax.random.uniform(kb, (out_features,), jnp.float32,
                           minval=-bound, maxval=bound)
    return w_t.astype(jnp.bfloat16), b


def make_params(key, input_dim):
    dims = [(input_dim, 128), (128, 64), (64, 32),    # encoder
            (32, 64), (64, 128), (128, input_dim)]    # decoder
    keys = jax.random.split(key, len(dims))
    return [init_linear(k, i, o) for k, (i, o) in zip(keys, dims)]


def reference_forward(x, params):
    """Plain-JAX reference with the same bf16-matmul / f32-accumulate math."""
    h = x.astype(jnp.bfloat16)
    relu_after = [True, True, False, True, True, False]
    for idx, ((w_t, b), relu) in enumerate(zip(params, relu_after)):
        y = jnp.dot(h, w_t, preferred_element_type=jnp.float32) + b
        if relu:
            y = jnp.maximum(y, 0.0)
        h = y.astype(jnp.bfloat16) if idx < len(params) - 1 else y
    return h


if __name__ == "__main__":
    key = jax.random.PRNGKey(0)
    k_params, k_x = jax.random.split(key)

    input_dim = 256
    batch = 256          # small demo; tile picker -> 128-row tiles, grid=2

    params = make_params(k_params, input_dim)
    x = jax.random.normal(k_x, (batch, input_dim), jnp.float32)

    out = autoencoder_forward(x, params)
    out = jax.block_until_ready(out)

    ref = reference_forward(x, params)
    assert out.shape == (batch, input_dim)
    assert jnp.allclose(out, ref, atol=2e-2, rtol=2e-2), "mismatch vs reference"

    print("KERNEL_OK")
</pallas_src>

<mosaic_0001>
module attributes {stable_mosaic.version = 11 : i64} {
  func.func @_autoencoder_kernel(%arg0: i32, %arg1: memref<128x256xf32, #tpu.memory_space<vmem>>, %arg2: memref<256x128xbf16, #tpu.memory_space<vmem>>, %arg3: memref<1x128xf32, #tpu.memory_space<vmem>>, %arg4: memref<128x64xbf16, #tpu.memory_space<vmem>>, %arg5: memref<1x64xf32, #tpu.memory_space<vmem>>, %arg6: memref<64x32xbf16, #tpu.memory_space<vmem>>, %arg7: memref<1x32xf32, #tpu.memory_space<vmem>>, %arg8: memref<32x64xbf16, #tpu.memory_space<vmem>>, %arg9: memref<1x64xf32, #tpu.memory_space<vmem>>, %arg10: memref<64x128xbf16, #tpu.memory_space<vmem>>, %arg11: memref<1x128xf32, #tpu.memory_space<vmem>>, %arg12: memref<128x256xbf16, #tpu.memory_space<vmem>>, %arg13: memref<1x256xf32, #tpu.memory_space<vmem>>, %arg14: memref<128x256xf32, #tpu.memory_space<vmem>>) attributes {dimension_semantics = [#tpu.dimension_semantics<parallel>], iteration_bounds = array<i64: 2>, scalar_prefetch = 0 : i64, scratch_operands = 0 : i64, tpu.core_type = #tpu.core_type<tc>, window_params = [{transform_indices = @transform_0, window_bounds = array<i64: 128, 256>}, {pipeline_mode = #tpu.pipeline_mode<synchronous>, transform_indices = @transform_1, window_bounds = array<i64: 256, 128>}, {pipeline_mode = #tpu.pipeline_mode<synchronous>, transform_indices = @transform_2, window_bounds = array<i64: 1, 128>}, {pipeline_mode = #tpu.pipeline_mode<synchronous>, transform_indices = @transform_3, window_bounds = array<i64: 128, 64>}, {pipeline_mode = #tpu.pipeline_mode<synchronous>, transform_indices = @transform_4, window_bounds = array<i64: 1, 64>}, {pipeline_mode = #tpu.pipeline_mode<synchronous>, transform_indices = @transform_5, window_bounds = array<i64: 64, 32>}, {pipeline_mode = #tpu.pipeline_mode<synchronous>, transform_indices = @transform_6, window_bounds = array<i64: 1, 32>}, {pipeline_mode = #tpu.pipeline_mode<synchronous>, transform_indices = @transform_7, window_bounds = array<i64: 32, 64>}, {pipeline_mode = #tpu.pipeline_mode<synchronous>, transform_indices = @transform_8, window_bounds = array<i64: 1, 64>}, {pipeline_mode = #tpu.pipeline_mode<synchronous>, transform_indices = @transform_9, window_bounds = array<i64: 64, 128>}, {pipeline_mode = #tpu.pipeline_mode<synchronous>, transform_indices = @transform_10, window_bounds = array<i64: 1, 128>}, {pipeline_mode = #tpu.pipeline_mode<synchronous>, transform_indices = @transform_11, window_bounds = array<i64: 128, 256>}, {pipeline_mode = #tpu.pipeline_mode<synchronous>, transform_indices = @transform_12, window_bounds = array<i64: 1, 256>}, {transform_indices = @transform_13, window_bounds = array<i64: 128, 256>}]} {
    %c0 = arith.constant 0 : index
    %c0_0 = arith.constant 0 : index
    %0 = vector.load %arg1[%c0, %c0_0] : memref<128x256xf32, #tpu.memory_space<vmem>>, vector<128x256xf32>
    %1 = arith.truncf %0 : vector<128x256xf32> to vector<128x256xbf16>
    %c0_1 = arith.constant 0 : index
    %c0_2 = arith.constant 0 : index
    %2 = vector.load %arg2[%c0_1, %c0_2] : memref<256x128xbf16, #tpu.memory_space<vmem>>, vector<256x128xbf16>
    %cst = arith.constant dense<0.000000e+00> : vector<128x128xf32>
    %3 = tpu.matmul %1, %2, %cst {dimension_numbers = #tpu.dot_dimension_numbers<[1], [0], [0], [1], [0, 0, 1, 1], [], []>} : vector<128x256xbf16>, vector<256x128xbf16>, vector<128x128xf32> -> vector<128x128xf32>
    %c0_3 = arith.constant 0 : index
    %c0_4 = arith.constant 0 : index
    %4 = vector.load %arg3[%c0_3, %c0_4] : memref<1x128xf32, #tpu.memory_space<vmem>>, vector<1x128xf32>
    %5 = vector.broadcast %4 : vector<1x128xf32> to vector<128x128xf32>
    %6 = arith.addf %3, %5 : vector<128x128xf32>
    %cst_5 = arith.constant 0.000000e+00 : f32
    %7 = vector.broadcast %cst_5 : f32 to vector<128x128xf32>
    %8 = arith.maximumf %6, %7 : vector<128x128xf32>
    %9 = arith.truncf %8 : vector<128x128xf32> to vector<128x128xbf16>
    %c0_6 = arith.constant 0 : index
    %c0_7 = arith.constant 0 : index
    %10 = vector.load %arg4[%c0_6, %c0_7] : memref<128x64xbf16, #tpu.memory_space<vmem>>, vector<128x64xbf16>
    %cst_8 = arith.constant dense<0.000000e+00> : vector<128x64xf32>
    %11 = tpu.matmul %9, %10, %cst_8 {dimension_numbers = #tpu.dot_dimension_numbers<[1], [0], [0], [1], [0, 0, 1, 1], [], []>} : vector<128x128xbf16>, vector<128x64xbf16>, vector<128x64xf32> -> vector<128x64xf32>
    %c0_9 = arith.constant 0 : index
    %c0_10 = arith.constant 0 : index
    %12 = vector.load %arg5[%c0_9, %c0_10] : memref<1x64xf32, #tpu.memory_space<vmem>>, vector<1x64xf32>
    %13 = vector.broadcast %12 : vector<1x64xf32> to vector<128x64xf32>
    %14 = arith.addf %11, %13 : vector<128x64xf32>
    %cst_11 = arith.constant 0.000000e+00 : f32
    %15 = vector.broadcast %cst_11 : f32 to vector<128x64xf32>
    %16 = arith.maximumf %14, %15 : vector<128x64xf32>
    %17 = arith.truncf %16 : vector<128x64xf32> to vector<128x64xbf16>
    %c0_12 = arith.constant 0 : index
    %c0_13 = arith.constant 0 : index
    %18 = vector.load %arg6[%c0_12, %c0_13] : memref<64x32xbf16, #tpu.memory_space<vmem>>, vector<64x32xbf16>
    %cst_14 = arith.constant dense<0.000000e+00> : vector<128x32xf32>
    %19 = tpu.matmul %17, %18, %cst_14 {dimension_numbers = #tpu.dot_dimension_numbers<[1], [0], [0], [1], [0, 0, 1, 1], [], []>} : vector<128x64xbf16>, vector<64x32xbf16>, vector<128x32xf32> -> vector<128x32xf32>
    %c0_15 = arith.constant 0 : index
    %c0_16 = arith.constant 0 : index
    %20 = vector.load %arg7[%c0_15, %c0_16] : memref<1x32xf32, #tpu.memory_space<vmem>>, vector<1x32xf32>
    %21 = vector.broadcast %20 : vector<1x32xf32> to vector<128x32xf32>
    %22 = arith.addf %19, %21 : vector<128x32xf32>
    %23 = arith.truncf %22 : vector<128x32xf32> to vector<128x32xbf16>
    %c0_17 = arith.constant 0 : index
    %c0_18 = arith.constant 0 : index
    %24 = vector.load %arg8[%c0_17, %c0_18] : memref<32x64xbf16, #tpu.memory_space<vmem>>, vector<32x64xbf16>
    %cst_19 = arith.constant dense<0.000000e+00> : vector<128x64xf32>
    %25 = tpu.matmul %23, %24, %cst_19 {dimension_numbers = #tpu.dot_dimension_numbers<[1], [0], [0], [1], [0, 0, 1, 1], [], []>} : vector<128x32xbf16>, vector<32x64xbf16>, vector<128x64xf32> -> vector<128x64xf32>
    %c0_20 = arith.constant 0 : index
    %c0_21 = arith.constant 0 : index
    %26 = vector.load %arg9[%c0_20, %c0_21] : memref<1x64xf32, #tpu.memory_space<vmem>>, vector<1x64xf32>
    %27 = vector.broadcast %26 : vector<1x64xf32> to vector<128x64xf32>
    %28 = arith.addf %25, %27 : vector<128x64xf32>
    %cst_22 = arith.constant 0.000000e+00 : f32
    %29 = vector.broadcast %cst_22 : f32 to vector<128x64xf32>
    %30 = arith.maximumf %28, %29 : vector<128x64xf32>
    %31 = arith.truncf %30 : vector<128x64xf32> to vector<128x64xbf16>
    %c0_23 = arith.constant 0 : index
    %c0_24 = arith.constant 0 : index
    %32 = vector.load %arg10[%c0_23, %c0_24] : memref<64x128xbf16, #tpu.memory_space<vmem>>, vector<64x128xbf16>
    %cst_25 = arith.constant dense<0.000000e+00> : vector<128x128xf32>
    %33 = tpu.matmul %31, %32, %cst_25 {dimension_numbers = #tpu.dot_dimension_numbers<[1], [0], [0], [1], [0, 0, 1, 1], [], []>} : vector<128x64xbf16>, vector<64x128xbf16>, vector<128x128xf32> -> vector<128x128xf32>
    %c0_26 = arith.constant 0 : index
    %c0_27 = arith.constant 0 : index
    %34 = vector.load %arg11[%c0_26, %c0_27] : memref<1x128xf32, #tpu.memory_space<vmem>>, vector<1x128xf32>
    %35 = vector.broadcast %34 : vector<1x128xf32> to vector<128x128xf32>
    %36 = arith.addf %33, %35 : vector<128x128xf32>
    %cst_28 = arith.constant 0.000000e+00 : f32
    %37 = vector.broadcast %cst_28 : f32 to vector<128x128xf32>
    %38 = arith.maximumf %36, %37 : vector<128x128xf32>
    %39 = arith.truncf %38 : vector<128x128xf32> to vector<128x128xbf16>
    %c0_29 = arith.constant 0 : index
    %c0_30 = arith.constant 0 : index
    %40 = vector.load %arg12[%c0_29, %c0_30] : memref<128x256xbf16, #tpu.memory_space<vmem>>, vector<128x256xbf16>
    %cst_31 = arith.constant dense<0.000000e+00> : vector<128x256xf32>
    %41 = tpu.matmul %39, %40, %cst_31 {dimension_numbers = #tpu.dot_dimension_numbers<[1], [0], [0], [1], [0, 0, 1, 1], [], []>} : vector<128x128xbf16>, vector<128x256xbf16>, vector<128x256xf32> -> vector<128x256xf32>
    %c0_32 = arith.constant 0 : index
    %c0_33 = arith.constant 0 : index
    %42 = vector.load %arg13[%c0_32, %c0_33] : memref<1x256xf32, #tpu.memory_space<vmem>>, vector<1x256xf32>
    %43 = vector.broadcast %42 : vector<1x256xf32> to vector<128x256xf32>
    %44 = arith.addf %41, %43 : vector<128x256xf32>
    %c0_34 = arith.constant 0 : index
    %c0_35 = arith.constant 0 : index
    %45 = vector.load %arg14[%c0_34, %c0_35] : memref<128x256xf32, #tpu.memory_space<vmem>>, vector<128x256xf32>
    tpu.vector_store %arg14[%c0_34, %c0_35], %44 {strides = array<i32>} : memref<128x256xf32, #tpu.memory_space<vmem>>, vector<128x256xf32>,
    return
  }
  func.func @transform_0(%arg0: i32) -> (i32, i32) {
    %c0_i32 = arith.constant 0 : i32
    %c0_i32_0 = arith.constant 0 : i32
    return %arg0, %c0_i32 : i32, i32
  }
  func.func @transform_1(%arg0: i32) -> (i32, i32) {
    %c0_i32 = arith.constant 0 : i32
    %c0_i32_0 = arith.constant 0 : i32
    %c0_i32_1 = arith.constant 0 : i32
    return %c0_i32, %c0_i32_0 : i32, i32
  }
  func.func @transform_2(%arg0: i32) -> (i32, i32) {
    %c0_i32 = arith.constant 0 : i32
    %c0_i32_0 = arith.constant 0 : i32
    %c0_i32_1 = arith.constant 0 : i32
    return %c0_i32, %c0_i32_0 : i32, i32
  }
  func.func @transform_3(%arg0: i32) -> (i32, i32) {
    %c0_i32 = arith.constant 0 : i32
    %c0_i32_0 = arith.constant 0 : i32
    %c0_i32_1 = arith.constant 0 : i32
    return %c0_i32, %c0_i32_0 : i32, i32
  }
  func.func @transform_4(%arg0: i32) -> (i32, i32) {
    %c0_i32 = arith.constant 0 : i32
    %c0_i32_0 = arith.constant 0 : i32
    %c0_i32_1 = arith.constant 0 : i32
    return %c0_i32, %c0_i32_0 : i32, i32
  }
  func.func @transform_5(%arg0: i32) -> (i32, i32) {
    %c0_i32 = arith.constant 0 : i32
    %c0_i32_0 = arith.constant 0 : i32
    %c0_i32_1 = arith.constant 0 : i32
    return %c0_i32, %c0_i32_0 : i32, i32
  }
  func.func @transform_6(%arg0: i32) -> (i32, i32) {
    %c0_i32 = arith.constant 0 : i32
    %c0_i32_0 = arith.constant 0 : i32
    %c0_i32_1 = arith.constant 0 : i32
    return %c0_i32, %c0_i32_0 : i32, i32
  }
  func.func @transform_7(%arg0: i32) -> (i32, i32) {
    %c0_i32 = arith.constant 0 : i32
    %c0_i32_0 = arith.constant 0 : i32
    %c0_i32_1 = arith.constant 0 : i32
    return %c0_i32, %c0_i32_0 : i32, i32
  }
  func.func @transform_8(%arg0: i32) -> (i32, i32) {
    %c0_i32 = arith.constant 0 : i32
    %c0_i32_0 = arith.constant 0 : i32
    %c0_i32_1 = arith.constant 0 : i32
    return %c0_i32, %c0_i32_0 : i32, i32
  }
  func.func @transform_9(%arg0: i32) -> (i32, i32) {
    %c0_i32 = arith.constant 0 : i32
    %c0_i32_0 = arith.constant 0 : i32
    %c0_i32_1 = arith.constant 0 : i32
    return %c0_i32, %c0_i32_0 : i32, i32
  }
  func.func @transform_10(%arg0: i32) -> (i32, i32) {
    %c0_i32 = arith.constant 0 : i32
    %c0_i32_0 = arith.constant 0 : i32
    %c0_i32_1 = arith.constant 0 : i32
    return %c0_i32, %c0_i32_0 : i32, i32
  }
  func.func @transform_11(%arg0: i32) -> (i32, i32) {
    %c0_i32 = arith.constant 0 : i32
    %c0_i32_0 = arith.constant 0 : i32
    %c0_i32_1 = arith.constant 0 : i32
    return %c0_i32, %c0_i32_0 : i32, i32
  }
  func.func @transform_12(%arg0: i32) -> (i32, i32) {
    %c0_i32 = arith.constant 0 : i32
    %c0_i32_0 = arith.constant 0 : i32
    %c0_i32_1 = arith.constant 0 : i32
    return %c0_i32, %c0_i32_0 : i32, i32
  }
  func.func @transform_13(%arg0: i32) -> (i32, i32) {
    %c0_i32 = arith.constant 0 : i32
    %c0_i32_0 = arith.constant 0 : i32
    return %arg0, %c0_i32 : i32, i32
  }
}

</mosaic_0001>

<bundles_post_ra>
// kernel: tpu_custom_call.1
= control target key start
LH: loop header
LB: loop body
LE: loop exit
PB: predicated region body
PF: predicated region fallthrough
CT: control target
= control target key end

     0   :  { %s3252_s0 = inlined_call_operand.hbm [shape: f32[256,256], index: 0, kind: input, shape index: {}]   ;;  %s3253_s1 = inlined_call_operand.vmem [shape: bf16[256,128], index: 1, kind: input, shape index: {}]   ;;  %s3254_s2 = inlined_call_operand.hbm [shape: f32[1,128], index: 2, kind: input, shape index: {}]   ;;  %s3255_s3 = inlined_call_operand.vmem [shape: bf16[128,64], index: 3, kind: input, shape index: {}]   ;;  %s3256_s4 = inlined_call_operand.hbm [shape: f32[1,64], index: 4, kind: input, shape index: {}]   ;;  %s3257_s5 = inlined_call_operand.vmem [shape: bf16[64,32], index: 5, kind: input, shape index: {}]   ;;  %s3258_s6 = inlined_call_operand.vmem [shape: f32[1,32], index: 6, kind: input, shape index: {}]   ;;  %s3259_s7 = inlined_call_operand.hbm [shape: bf16[32,64], index: 7, kind: input, shape index: {}]   ;;  %s3260_s8 = inlined_call_operand.vmem [shape: f32[1,64], index: 8, kind: input, shape index: {}]   ;;  %s3261_s9 = inlined_call_operand.vmem [shape: bf16[64,128], index: 9, kind: input, shape index: {}]   ;;  %s3262_s10 = inlined_call_operand.vmem [shape: f32[1,128], index: 10, kind: input, shape index: {}]   ;;  %s3263_s11 = inlined_call_operand.hbm [shape: bf16[128,256], index: 11, kind: input, shape index: {}]   ;;  %s3264_s12 = inlined_call_operand.vmem [shape: f32[1,256], index: 12, kind: input, shape index: {}]   ;;  %s3265_s13 = inlined_call_operand.hbm [shape: f32[256,256], index: 13, kind: output, shape index: {}]  }
   0x1   :  { %3272 = sst [smem:[#allocation18_spill]] %s3254_s2 }
   0x2   :  { %3273 = sst [smem:[#allocation19_spill]] %s3262_s10 }
   0x3   :  { %3274 = sst [smem:[#allocation20_spill]] %s3264_s12 }
   0x4   :  { %3275 = sst [smem:[#allocation21_spill]] %s3265_s13 }
   0x5   :  { %18 = vsyncpa [#allocation3], 0 }
   0x6   :  { %20 = vsyncpa [#allocation3 + $0x1], 0 }
   0x7   :  { %21 = vsyncpa [#allocation6], 0 }
   0x8   :  { %22 = vsyncpa [#allocation9], 0 }
   0x9   :  { %23 = vsyncpa [#allocation4], 0 }
   0xa   :  { %25 = vsyncpa [#allocation4 + $0x1], 0  ;;  %s2708_s25 = smov 0   ;;  %s2710_s26 = smov 0  }
   0xb   :  { %s2712_s27 = smov 0   ;;  %s2714_s28 = smov 0  }
   0xc LB: > { %3276 = sst [smem:[#allocation16_spill]] %s2609_s25  ;;  %s2729_s29 = sadd.s32 4294967295, %s2621_s28   ;;  %s2621_s28 = sphi %s2714_s28, %s3303_s28   ;;  %s2617_s27 = sphi %s2712_s27, %s3302_s27   ;;  %s2613_s26 = sphi %s2710_s26, %s3301_s26   ;;  %s2609_s25 = sphi %s2708_s25, %s3300_s25  }
   0xd   : > { %s1914_s30 = sadd.s32 4294967294, %s2621_s28   ;;  %p51_p0 = scmp.ne.s32.totalorder %s2613_s26, %s2609_s25 }
   0xe   : > { %p3269_p1 = scmp.eq.s32.totalorder %s2729_s29, 0  ;;  %p333_p3 = scmp.eq.s32.totalorder %s1914_s30, 1 }
   0xf   : > { %p1915_p5 = scmp.ge.s32.totalorder %s2621_s28, 1  ;;  %p340_p7 = scmp.lt.s32.totalorder %s2621_s28, 3 }
  0x10   : > { %p2738_p4 = por %p3269_p1, %p51_p0  ;;  %p2743_p6 = por %p333_p3, %p51_p0 }
  0x11   : > { %p2748_p8 = pnand %p1915_p5, %p340_p7  ;;  %s2623_s17 = smov [#allocation5]  }
  0x12   : > { %s3277_s14 = scalar_select %p2738_p4, 1, 0 }
  0x13   : > { %s3278_s15 = scalar_select %p2743_p6, 1, 0 }
  0x14   : > { %s3280_s16 = scalar_select %p2748_p8, 1, 0 }
  0x15   : > { %3279 = sst [smem:[#allocation17_spill]] %s3278_s15  ;;  %s356_s18 = sshll.u32 %s2623_s17, 4  ;;  %s357_s18 = int_to_ptr.vmem [resolvable:$true] %s356_s18 }
  0x16   : > { %p2271_p10 = pneg %p2748_p8  ;;  %s2624_s19 = smov [#allocation8]  }
  0x17   : > { %s386_s20 = sshll.u32 %s2624_s19, 4  ;;  %s2625_s22 = smov [#allocation7]   ;;  %s2761_s20 = int_to_ptr.vmem [resolvable:$true] %s386_s20 }
  0x18   : > { %p2757_p11 = pnand %p2271_p10, %p3269_p1  ;;  %s2763_s23 = sshll.u32 %s2625_s22, 4  ;;  %s371_s23 = int_to_ptr.vmem [resolvable:$true] %s2763_s23 }
  0x19   : > { %s3282_s2 = sld [smem:[#allocation18_spill]] }
  0x1a   : > { %p2773_p13 = pneg %p2757_p11 }
  0x1f   : > { %s2405_s17 = scalar_lea.hbm %s3282_s2, 16 }
  0x20   : > { %p2406_p12 = scmp.ne.s32.totalorder %s3282_s2, %s2405_s17  ;;  %p2412_p5 = scmp.lt.u32.totalorder %s2405_s17, %s3282_s2 }
  0x22   : > { %p2408_p0 = pnand %p2773_p13, %p2406_p12 }
  0x24   : > { %p2409_p3 = pneg %p2408_p0 }
  0x26   : > { %p2414_p7 = pnand %p2412_p5, %p2409_p3 }
  0x28   : > { %2417 = shalt.err (!%p2414_p7)
}
  0x29   : > { %s2418_s24 = scalar_lea.vmem %s357_s18, 16  ;;  %s2425_s25 = scalar_lea.vmem %s357_s18, 32 }
  0x2a   : > { %p2419_p10 = scmp.ne.s32.totalorder %s357_s18, %s2418_s24  ;;  %p2426_p2 = scmp.lt.s32.totalorder %s357_s18, %s357_s18 }
  0x2b   : > { %p2427_p6 = scmp.lt.s32.totalorder %s2425_s25, %s2418_s24 }
  0x2c   : > { %p2421_p9 = pnand %p2419_p10, %p2773_p13 }
  0x2d   : > { %p2428_p4 = por %p2427_p6, %p2426_p2 }
  0x2e   : > { %p2422_p1 = pneg %p2421_p9 }
  0x30   : > { %p2429_p8 = pnand %p2428_p4, %p2422_p1 }
  0x32   : > { %2432 = shalt.err (!%p2429_p8)
}
  0x33   : > { %2274 = dma.hbm_to_vmem [thread:$0]  (!%p2757_p11), %s3282_s2, 16, %s357_s18, [#allocation6]  }
  0x34   : > { %s2433_s22 = scalar_lea.hbm %s3259_s7, 256 }
  0x35   : > { %p2434_p9 = scmp.ne.s32.totalorder %s3259_s7, %s2433_s22  ;;  %p2440_p1 = scmp.lt.u32.totalorder %s2433_s22, %s3259_s7 }
  0x37   : > { %p2436_p12 = pnand %p2434_p9, %p2773_p13 }
  0x39   : > { %p2437_p2 = pneg %p2436_p12 }
  0x3b   : > { %p2442_p4 = pnand %p2440_p1, %p2437_p2 }
  0x3d   : > { %2445 = shalt.err (!%p2442_p4)
}
  0x3e   : > { %s2446_s18 = scalar_lea.vmem %s2761_s20, 256  ;;  %p2454_p3 = scmp.lt.s32.totalorder %s2761_s20, %s2761_s20 }
  0x3f   : > { %p2447_p6 = scmp.ne.s32.totalorder %s2761_s20, %s2446_s18  ;;  %p2455_p5 = scmp.lt.s32.totalorder %s2446_s18, %s2446_s18 }
  0x41   : > { %p2449_p8 = pnand %p2447_p6, %p2773_p13  ;;  %p2456_p7 = por %p2455_p5, %p2454_p3 }
  0x43   : > { %p2450_p0 = pneg %p2449_p8 }
  0x45   : > { %p2457_p10 = pnand %p2456_p7, %p2450_p0 }
  0x47   : > { %2460 = shalt.err (!%p2457_p10)
}
  0x48   : > { %s2626_s10 = smov 64   ;;  %s2627_s12 = smov 4  }
  0x49   : > { %2280 = dma.hbm_to_vmem [thread:$0]  (!%p2757_p11), %s3259_s7, 256, %s2761_s20, [#allocation9], %s2626_s10, %s2626_s10, %s2627_s12  }
  0x4a   : > { %s2461_s22 = scalar_lea.hbm %s3256_s4, 16 }
  0x4b   : > { %p2462_p9 = scmp.ne.s32.totalorder %s3256_s4, %s2461_s22  ;;  %p2468_p1 = scmp.lt.u32.totalorder %s2461_s22, %s3256_s4 }
  0x4d   : > { %p2464_p12 = pnand %p2462_p9, %p2773_p13 }
  0x4f   : > { %p2465_p2 = pneg %p2464_p12 }
  0x51   : > { %p2470_p4 = pnand %p2468_p1, %p2465_p2 }
  0x53   : > { %2473 = shalt.err (!%p2470_p4)
}
  0x54   : > { %s2474_s15 = scalar_lea.vmem %s371_s23, 16  ;;  %s2481_s20 = scalar_lea.vmem %s371_s23, 32 }
  0x55   : > { %p2475_p6 = scmp.ne.s32.totalorder %s371_s23, %s2474_s15  ;;  %p2482_p3 = scmp.lt.s32.totalorder %s371_s23, %s371_s23 }
  0x56   : > { %p2483_p5 = scmp.lt.s32.totalorder %s2481_s20, %s2474_s15 }
  0x57   : > { %p2477_p8 = pnand %p2475_p6, %p2773_p13 }
  0x58   : > { %p2484_p7 = por %p2483_p5, %p2482_p3 }
  0x59   : > { %p2478_p0 = pneg %p2477_p8 }
  0x5b   : > { %p2485_p10 = pnand %p2484_p7, %p2478_p0 }
  0x5d   : > { %2488 = shalt.err (!%p2485_p10)
}
  0x5e   : > { %2277 = dma.hbm_to_vmem [thread:$0]  (!%p2757_p11), %s3256_s4, 16, %s371_s23, [#allocation6]  }
  0x5f   : > { %s2628_s2 = smov [#allocation10]   ;;  %s2489_s22 = scalar_lea.hbm %s3263_s11, 2048 }
  0x60   : > { %s408_s30 = sshll.u32 %s2628_s2, 4  ;;  %p2490_p9 = scmp.ne.s32.totalorder %s3263_s11, %s2489_s22  ;;  %s409_s30 = int_to_ptr.vmem [resolvable:$true] %s408_s30 }
  0x61   : > { %p2496_p1 = scmp.lt.u32.totalorder %s2489_s22, %s3263_s11 }
  0x62   : > { %p2492_p12 = pnand %p2490_p9, %p2773_p13 }
  0x64   : > { %p2493_p2 = pneg %p2492_p12 }
  0x66   : > { %p2498_p4 = pnand %p2496_p1, %p2493_p2 }
  0x68   : > { %2501 = shalt.err (!%p2498_p4)
}
  0x69   : > { %s2502_s23 = scalar_lea.vmem %s409_s30, 2048  ;;  %p2510_p3 = scmp.lt.s32.totalorder %s409_s30, %s409_s30 }
  0x6a   : > { %p2503_p6 = scmp.ne.s32.totalorder %s409_s30, %s2502_s23  ;;  %p2511_p5 = scmp.lt.s32.totalorder %s2502_s23, %s2502_s23 }
  0x6c   : > { %p2505_p8 = pnand %p2503_p6, %p2773_p13  ;;  %p2512_p7 = por %p2511_p5, %p2510_p3 }
  0x6e   : > { %p2506_p0 = pneg %p2505_p8 }
  0x70   : > { %p2513_p10 = pnand %p2512_p7, %p2506_p0 }
  0x72   : > { %2516 = shalt.err (!%p2513_p10)
}
  0x73   : > { %s2629_s20 = smov 128   ;;  %s2630_s19 = smov 8  }
  0x74   : > { %2283 = dma.hbm_to_vmem [thread:$0]  (!%p2757_p11), %s3263_s11, 2048, %s409_s30, [#allocation9], %s2629_s20, %s2629_s20, %s2630_s19  }
  0x75   : > { %s2850_s2 = sadd.s32 1, %s2621_s28   ;;  %s38_s17 = sadd.s32 1, %s2617_s27 }
  0x76   : > { %s35_s13 = ssub.s32 %s2621_s28, %s2850_s2  ;;  %p45_p9 = scmp.ne.s32.totalorder %s2617_s27, %s2613_s26 }
  0x77   : > { %p36_p13 = scmp.eq.s32.totalorder %s35_s13, 0  ;;  %p46_p12 = scmp.eq.s32.totalorder %s2621_s28, 0 }
  0x78   : > { %p3284_p1 = scmp.eq.s32.totalorder %s2729_s29, 1  ;;  %p2296_p6 = scmp.lt.s32.totalorder %s2621_s28, 2 }
  0x79   : > { %s2859_s22 = scalar_select %p36_p13, %s2617_s27, %s38_s17  }
  0x7a   : > { %p47_p2 = por %p46_p12, %p45_p9  ;;  %p2863_p4 = por %p3284_p1, %p45_p9 }
  0x7b   : > { %s425_s21 = sand.u32 1, %s2617_s27   ;;  %s2018_s30 = sshll.u32 %s2621_s28, 12 }
  0x7c   : > { %s1921_s25 = sshll.u32 %s425_s21, 8  ;;  %s2873_s23 = scalar_lea.hbm %s3252_s0, %s2018_s30 }
  0x7d   : > { %s429_s20 = scalar_lea.vmem [#allocation2], %s1921_s25  ;;  %p2877_p11 = pnand %p2296_p6, %p47_p2 }
  0x7e   : > { %s437_s19 = sshll.u32 %s429_s20, 4  ;;  %s2881_s12 = scalar_lea.sflag [#allocation3], %s425_s21  ;;  %s2875_s19 = int_to_ptr.vmem [resolvable:$true] %s437_s19 }
  0x7f   : > { %s2517_s13 = scalar_lea.hbm %s2873_s23, 4096  ;;  %p2519_p0 = pneg %p2877_p11 }
  0x80   : > { %p2518_p8 = scmp.ne.s32.totalorder %s2873_s23, %s2517_s13  ;;  %s2522_s30 = scalar_lea.hbm %s3252_s0, 8192 }
  0x81   : > { %p2523_p7 = scmp.lt.u32.totalorder %s2873_s23, %s3252_s0  ;;  %p2524_p10 = scmp.lt.u32.totalorder %s2522_s30, %s2517_s13 }
  0x82   : > { %p2520_p3 = pnand %p2519_p0, %p2518_p8  ;;  %p2526_p9 = scmp.lt.u32.totalorder %s2517_s13, %s2873_s23 }
  0x83   : > { %p2525_p13 = por %p2524_p10, %p2523_p7 }
  0x84   : > { %p2521_p5 = pneg %p2520_p3 }
  0x85   : > { %p2527_p12 = por %p2526_p9, %p2525_p13 }
  0x87   : > { %p2528_p2 = pnand %p2527_p12, %p2521_p5 }
  0x89   : > { %2531 = shalt.err (!%p2528_p2)
}
  0x8a   : > { %s2532_s21 = scalar_lea.vmem %s2875_s19, 4096  ;;  %s2631_s20 = smov [#allocation2]  }
  0x8b   : > { %p2533_p1 = scmp.ne.s32.totalorder %s2875_s19, %s2532_s21  ;;  %s2537_s17 = sshll.u32 %s2631_s20, 4  ;;  %s2538_s17 = int_to_ptr.vmem [resolvable:$false] %s2537_s17 }
  0x8c   : > { %s2539_s25 = scalar_lea.vmem %s2538_s17, 8192  ;;  %p2540_p3 = scmp.lt.s32.totalorder %s2875_s19, %s2538_s17 }
  0x8d   : > { %p2535_p6 = pnand %p2533_p1, %p2519_p0  ;;  %p2541_p7 = scmp.lt.s32.totalorder %s2539_s25, %s2532_s21 }
  0x8f   : > { %p2536_p8 = pneg %p2535_p6  ;;  %p2542_p10 = por %p2541_p7, %p2540_p3 }
  0x91   : > { %p2543_p13 = pnand %p2542_p10, %p2536_p8 }
  0x93   : > { %2546 = shalt.err (!%p2543_p13)
}
  0x94   : > { %s2632_s13 = smov 256   ;;  %s2633_s30 = smov 16  }
  0x95   : > { %2287 = dma.hbm_to_vmem [thread:$0]  (!%p2877_p11), %s2873_s23, 4096, %s2875_s19, %s2881_s12, %s2632_s13, %s2632_s13, %s2633_s30  }
  0x96   : > { %p3287_p0 = scmp.ne.s32.totalorder %s3280_s16, 0 }
  0x97   : > { %s2912_s18 = sand.u32 (!%p3287_p0), 1, %s2613_s26   ;;  %p3288_p5 = scmp.ne.s32.totalorder (!%p3287_p0), %s3277_s14, 0 }
  0x98   : > { %449 = sbr.rel (%p3287_p0) target bundleno = 1604 (0x644), region = 72  ;;  %s1926_s15 = sshll.u32 (!%p3287_p0), %s2912_s18, 8 }
  0x99   : > { %s452_s21 = scalar_lea.sflag (!%p3287_p0), [#allocation3], %s2912_s18  ;;  %s2918_s20 = scalar_lea.vmem (!%p3287_p0), [#allocation2], %s1926_s15 }
  0x9f   : > { %2592 = dma.done.wait (%p3288_p5), %s452_s21, 4096  }
  0xa0   : > { %2594 = vsyncadd (%p3288_p5), %s452_s21, 4294963200  ;;  %p3289_p11 = scmp.eq.s32.totalorder %s2729_s29, 0 }
  0xa2   : > { %2596 = dma.done.wait (%p3289_p11), [#allocation6], 32   ;;  %p3290_p9 = pmov %p3289_p11 }
  0xa4   : > { %2598 = vsyncadd (%p3290_p9), [#allocation6], 4294967264  ;;  %p3291_p12 = pmov %p3290_p9 }
  0xa5   : > { %p3292_p2 = pmov %p3290_p9 }
  0xa6   : > { %2600 = dma.done.wait (%p3291_p12), [#allocation9], 2304  }
  0xa7   : > { %2602 = vsyncadd (%p3292_p2), [#allocation9], 4294964992  ;;  %v2347_v0 = vld [vmem:[%s3253_s1 + $0x40] sm:$0xff]   ;;  %v2349_v2 = vld [vmem:[%s3253_s1 + $0x48] sm:$0xff]   ;;  %vm1052_vm0 = vcmask 523264   ;;  %vm1205_vm1 = vcmask 261120  }
  0xa8   : > { %v2348_v1 = vld [vmem:[%s3253_s1] sm:$0xff]   ;;  %2021 = vmatprep.subr.bf16.mxu0 %v2347_v0  ;;  %2235 = vmatprep.subr.bf16.mxu1 %v2347_v0  ;;  %v2350_v3 = vld [vmem:[%s3253_s1 + $0x8] sm:$0xff]   ;;  %v2351_v4 = vld [vmem:[%s3253_s1 + $0x50] sm:$0xff]   ;;  %s3294_s14 = sld [smem:[#allocation20_spill]]  ;;  %s3137_s12 = scalar_lea.vmem [#allocation11], %s1926_s15 }
  0xa9   : > { %2022 = vmatpush3.bf16.msra.mxu0 %v2348_v1  ;;  %2243 = vmatpush3.bf16.msra.mxu1 %v2348_v1  ;;  %v2352_v5 = vld [vmem:[%s3253_s1 + $0x10] sm:$0xff]   ;;  %v2353_v6 = vld [vmem:[%s3253_s1 + $0x58] sm:$0xff]   ;;  %v2355_v8 = vld [vmem:[%s3253_s1 + $0x60] sm:$0xff]   ;;  %s2020_s15 = sshll.u32 %s2729_s29, 12  ;;  %s1803_s17 = sshll.u32 %s3137_s12, 4  ;;  %s3204_s17 = int_to_ptr.vmem [resolvable:$true] %s1803_s17 }
  0xaa   : > { %2023 = vmatprep.subr.bf16.mxu0 %v2349_v2  ;;  %2236 = vmatprep.subr.bf16.mxu1 %v2349_v2  ;;  %v2354_v7 = vld [vmem:[%s3253_s1 + $0x18] sm:$0xff]   ;;  %v2356_v9 = vld [vmem:[%s3253_s1 + $0x20] sm:$0xff]   ;;  %v2357_v10 = vld [vmem:[%s3253_s1 + $0x68] sm:$0xff]   ;;  %s3295_s30 = sld [smem:[#allocation21_spill]]  ;;  %s1789_s29 = scalar_lea.sflag [#allocation4], %s2912_s18 }
  0xab   : > { %v518_v11 = vld [vmem:[%s2918_s20 + $0x8] sm:$0xff]  ;;  %v520_v12 = vld [vmem:[%s2918_s20 + $0x18] sm:$0xff]  ;;  %v2359_v17 = vld [vmem:[%s3253_s1 + $0x70] sm:$0xff]   ;;  %s2547_s16 = scalar_lea.vmem %s3204_s17, 4096  ;;  %s2635_s23 = smov [#allocation11]  }
  0xac   : > { %v550_v13 = vpack.c.bf16 %v520_v12, %v518_v11  ;;  %v2358_v14 = vld [vmem:[%s3253_s1 + $0x28] sm:$0xff]   ;;  %v536_v16 = vld [vmem:[%s2918_s20 + $0x98] sm:$0xff]  ;;  %v2360_v19 = vld [vmem:[%s3253_s1 + $0x30] sm:$0xff]   ;;  %p2548_p1 = scmp.ne.s32.totalorder %s3204_s17, %s2547_s16 }
  0xad   : > { %2024 = vmatpush3.bf16.msra.mxu0 %v2350_v3  ;;  %2244 = vmatpush3.bf16.msra.mxu1 %v2350_v3  ;;  %v534_v15 = vld [vmem:[%s2918_s20 + $0x88] sm:$0xff]  ;;  %v2361_v20 = vld [vmem:[%s3253_s1 + $0x78] sm:$0xff]   ;;  %v517_v22 = vld [vmem:[%s2918_s20] sm:$0xff] }
  0xae   : > { %2025 = vmatprep.subr.bf16.mxu0 %v2351_v4  ;;  %2237 = vmatprep.subr.bf16.mxu1 %v2351_v4  ;;  %v558_v18 = vpack.c.bf16 %v536_v16, %v534_v15  ;;  %v2362_v21 = vld [vmem:[%s3253_s1 + $0x38] sm:$0xff]   ;;  %v519_v23 = vld [vmem:[%s2918_s20 + $0x10] sm:$0xff]  ;;  %v522_v24 = vld [vmem:[%s2918_s20 + $0x28] sm:$0xff]  ;;  %p2549_p6 = pnand %p2548_p1, %p2863_p4 }
  0xaf   : > { %732 = vmatprep.mubr.bf16.mxu0 %v550_v13  ;;  %v524_v25 = vld [vmem:[%s2918_s20 + $0x38] sm:$0xff]  ;;  %v533_v26 = vld [vmem:[%s2918_s20 + $0x80] sm:$0xff]  ;;  %v535_v27 = vld [vmem:[%s2918_s20 + $0x90] sm:$0xff]  ;;  %v549_v31 = vpack.c.bf16 %v519_v23, %v517_v22 }
  0xb0   : > { %764 = vmatprep.mubr.bf16.mxu1 %v558_v18  ;;  %v538_v28 = vld [vmem:[%s2918_s20 + $0xa8] sm:$0xff]  ;;  %v540_v29 = vld [vmem:[%s2918_s20 + $0xb8] sm:$0xff]  ;;  %v2363_v30 = vld [vmem:[%s3255_s3] sm:$0xff]   ;;  %v552_v32 = vpack.c.bf16 %v524_v25, %v522_v24  ;;  %v557_v33 = vpack.c.bf16 %v535_v27, %v533_v26  ;;  %s3202_s21 = scalar_lea.hbm %s3295_s30, %s2020_s15  ;;  %p2550_p8 = pneg %p2549_p6 }
  0xb1   : > { %2026 = vmatpush3.bf16.msra.mxu0 %v2352_v5  ;;  %2245 = vmatpush3.bf16.msra.mxu1 %v2352_v5  ;;  %v2364_v34 = vld [vmem:[%s3255_s3 + $0x8] sm:$0xff]   ;;  %v560_v35 = vpack.c.bf16 %v540_v29, %v538_v28  ;;  %v521_v36 = vld [vmem:[%s2918_s20 + $0x20] sm:$0xff]  ;;  %v523_v37 = vld [vmem:[%s2918_s20 + $0x30] sm:$0xff] }
  0xb2   : > { %2027 = vmatprep.subr.bf16.mxu0 %v2353_v6  ;;  %2238 = vmatprep.subr.bf16.mxu1 %v2353_v6  ;;  %v526_v38 = vld [vmem:[%s2918_s20 + $0x48] sm:$0xff]  ;;  %v528_v39 = vld [vmem:[%s2918_s20 + $0x58] sm:$0xff]  ;;  %v537_v40 = vld [vmem:[%s2918_s20 + $0xa0] sm:$0xff]  ;;  %v551_v45 = vpack.c.bf16 %v523_v37, %v521_v36 }
  0xb3   : > { %v539_v41 = vld [vmem:[%s2918_s20 + $0xb0] sm:$0xff]  ;;  %v542_v42 = vld [vmem:[%s2918_s20 + $0xc8] sm:$0xff]  ;;  %v544_v43 = vld [vmem:[%s2918_s20 + $0xd8] sm:$0xff]  ;;  %v554_v46 = vpack.c.bf16 %v528_v39, %v526_v38 }
  0xb4   : > { %v2365_v44 = vld [vmem:[%s3255_s3 + $0x10] sm:$0xff]   ;;  %v559_v47 = vpack.c.bf16 %v539_v41, %v537_v40  ;;  %v2366_v48 = vld [vmem:[%s3255_s3 + $0x18] sm:$0xff]   ;;  %v562_v49 = vpack.c.bf16 %v544_v43, %v542_v42  ;;  %v525_v50 = vld [vmem:[%s2918_s20 + $0x40] sm:$0xff] }
  0xb5   : > { %2028 = vmatpush3.bf16.msra.mxu0 %v2354_v7  ;;  %2246 = vmatpush3.bf16.msra.mxu1 %v2354_v7  ;;  %v527_v51 = vld [vmem:[%s2918_s20 + $0x50] sm:$0xff]  ;;  %v530_v52 = vld [vmem:[%s2918_s20 + $0x68] sm:$0xff]  ;;  %v532_v53 = vld [vmem:[%s2918_s20 + $0x78] sm:$0xff] }
  0xb6   : > { %2029 = vmatprep.subr.bf16.mxu0 %v2355_v8  ;;  %2239 = vmatprep.subr.bf16.mxu1 %v2355_v8  ;;  %v541_v54 = vld [vmem:[%s2918_s20 + $0xc0] sm:$0xff]  ;;  %v543_v55 = vld [vmem:[%s2918_s20 + $0xd0] sm:$0xff]  ;;  %v546_v56 = vld [vmem:[%s2918_s20 + $0xe8] sm:$0xff]  ;;  %v553_v58 = vpack.c.bf16 %v527_v51, %v525_v50  ;;  %v556_v59 = vpack.c.bf16 %v532_v53, %v530_v52 }
  0xb7   : > { %v548_v57 = vld [vmem:[%s2918_s20 + $0xf8] sm:$0xff]  ;;  %v561_v60 = vpack.c.bf16 %v543_v55, %v541_v54  ;;  %v529_v62 = vld [vmem:[%s2918_s20 + $0x60] sm:$0xff]  ;;  %v531_v63 = vld [vmem:[%s2918_s20 + $0x70] sm:$0xff] }
  0xb8   : > { %v564_v61 = vpack.c.bf16 %v548_v57, %v546_v56  ;;  %v545_v0 = vld [vmem:[%s2918_s20 + $0xe0] sm:$0xff]  ;;  %v547_v1 = vld [vmem:[%s2918_s20 + $0xf0] sm:$0xff]  ;;  %v555_v2 = vpack.c.bf16 %v531_v63, %v529_v62  ;;  %v2368_v5 = vld [vmem:[%s3255_s3 + $0x28] sm:$0xff]   ;;  %s3293_s20 = sld [smem:[#allocation19_spill]] }
  0xb9   : > { %2030 = vmatpush3.bf16.msra.mxu0 %v2356_v9  ;;  %2247 = vmatpush3.bf16.msra.mxu1 %v2356_v9  ;;  %v563_v3 = vpack.c.bf16 %v547_v1, %v545_v0  ;;  %v2367_v4 = vld [vmem:[%s3255_s3 + $0x20] sm:$0xff]   ;;  %v2369_v6 = vld [vmem:[%s3255_s3 + $0x30] sm:$0xff]   ;;  %v2370_v7 = vld [vmem:[%s3255_s3 + $0x38] sm:$0xff]  }
  0xba   : > { %2031 = vmatprep.subr.bf16.mxu0 %v2357_v10  ;;  %2240 = vmatprep.subr.bf16.mxu1 %v2357_v10  ;;  %v3039_v8 = vld [vmem:[%s3257_s5] sm:$0xff]  }
  0xbb   : > { %v3042_v10 = vld [vmem:[#allocation5] ss:$0 sm:$0xff] }
  0xbd   : > { %2032 = vmatpush3.bf16.msra.mxu0 %v2358_v14  ;;  %2248 = vmatpush3.bf16.msra.mxu1 %v2358_v14 }
  0xbe   : > { %2033 = vmatprep.subr.bf16.mxu0 %v2359_v17  ;;  %2241 = vmatprep.subr.bf16.mxu1 %v2359_v17 }
  0xc1   : > { %2034 = vmatpush3.bf16.msra.mxu0 %v2360_v19  ;;  %2249 = vmatpush3.bf16.msra.mxu1 %v2360_v19 }
  0xc2   : > { %2035 = vmatprep.subr.bf16.mxu0 %v2361_v20  ;;  %2242 = vmatprep.subr.bf16.mxu1 %v2361_v20 }
  0xc5   : > { %2036 = vmatpush3.bf16.msra.mxu0 %v2362_v21  ;;  %2250 = vmatpush3.bf16.msra.mxu1 %v2362_v21 }
  0xc6   : > { %2135 = vmatprep.subr.bf16.mxu1 %v2363_v30 }
  0xc8   : > { %733 = vmatmul.mubr.bf16.vlgmr.msra.gmra.mrb[0].mxu0 %v549_v31  ;;  %765 = vmatmul.mubr.bf16.vlgmr.msra.gmra.mrb[0].mxu1 %v557_v33 }
  0xc9   : > { %740 = vmatprep.mubr.bf16.mxu0 %v552_v32  ;;  %772 = vmatprep.mubr.bf16.mxu1 %v560_v35 }
  0xca   : > { %2136 = vmatpush3.bf16.msra.mxu1 %v2363_v30 }
  0xcb   : > { %2137 = vmatprep.subr.bf16.mxu1 %v2364_v34 }
  0xce   : > { %2138 = vmatpush3.bf16.msra.mxu1 %v2364_v34 }
  0xcf   : > { %2139 = vmatprep.subr.bf16.mxu1 %v2365_v44 }
  0xd0   : > { %741 = vmatmul.mubr.bf16.gmra.mrb[4].mxu0 %v551_v45  ;;  %773 = vmatmul.mubr.bf16.gmra.mrb[4].mxu1 %v559_v47 }
  0xd1   : > { %748 = vmatprep.mubr.bf16.mxu0 %v554_v46  ;;  %780 = vmatprep.mubr.bf16.mxu1 %v562_v49 }
  0xd2   : > { %2140 = vmatpush3.bf16.msra.mxu1 %v2365_v44 }
  0xd3   : > { %2141 = vmatprep.subr.bf16.mxu1 %v2366_v48 }
  0xd6   : > { %2142 = vmatpush3.bf16.msra.mxu1 %v2366_v48 }
  0xd7   : > { %2143 = vmatprep.subr.bf16.mxu1 %v2367_v4 }
  0xd8   : > { %749 = vmatmul.mubr.bf16.gmra.mrb[8].mxu0 %v553_v58  ;;  %781 = vmatmul.mubr.bf16.gmra.mrb[8].mxu1 %v561_v60 }
  0xd9   : > { %756 = vmatprep.mubr.bf16.mxu0 %v556_v59  ;;  %788 = vmatprep.mubr.bf16.mxu1 %v564_v61  ;;  %v2372_v59 = vld [vmem:[%s3257_s5 + $0x8] sm:$0xff]  }
  0xda   : > { %2144 = vmatpush3.bf16.msra.mxu1 %v2367_v4 }
  0xdb   : > { %2145 = vmatprep.subr.bf16.mxu1 %v2368_v5 }
  0xde   : > { %2146 = vmatpush3.bf16.msra.mxu1 %v2368_v5 }
  0xdf   : > { %2147 = vmatprep.subr.bf16.mxu1 %v2369_v6 }
  0xe0   : > { %757 = vmatmul.mubr.bf16.gmra.mrb[12].mxu0 %v555_v2  ;;  %789 = vmatmul.mubr.bf16.gmra.mrb[12].mxu1 %v563_v3 }
  0xe2   : > { %2148 = vmatpush3.bf16.msra.mxu1 %v2369_v6  ;;  %v2373_v6 = vld [vmem:[%s3257_s5 + $0x10] sm:$0xff]  }
  0xe3   : > { %2149 = vmatprep.subr.bf16.mxu1 %v2370_v7 }
  0xe6   : > { %2150 = vmatpush3.bf16.msra.mxu1 %v2370_v7 }
  0xe7   : > { %2167 = vmatprep.subr.bf16.mxu1 %v3039_v8 }
 0x19b   : > { %v2037_v9 = vpop.f32.mrb[0].mxu0  ;;  %v2061_v12 = vpop.f32.mrb[0].mxu1 }
 0x19c   : > { %v2038_v11 = vpop.f32.mrb[1].mxu0  ;;  %v2062_v15 = vpop.f32.mrb[1].mxu1 }
 0x19d   : > { %v2039_v13 = vadd.f32 %v2038_v11, %v2037_v9  ;;  %v2040_v14 = vpop.f32.mrb[2].mxu0  ;;  %v2063_v17 = vadd.f32 %v2062_v15, %v2061_v12  ;;  %v2064_v18 = vpop.f32.mrb[2].mxu1 }
 0x19e   : > { %v2041_v16 = vpop.f32.mrb[3].mxu0  ;;  %v2065_v21 = vpop.f32.mrb[3].mxu1 }
 0x19f   : > { %v735_v19 = vadd.f32 %v2039_v13, %v3042_v10  ;;  %v2042_v20 = vadd.f32 %v2041_v16, %v2040_v14  ;;  %v767_v22 = vadd.f32 %v2063_v17, %v3042_v10  ;;  %v2066_v23 = vadd.f32 %v2065_v21, %v2064_v18 }
 0x1a1   : > { %v738_v24 = vadd.f32 %v2042_v20, %v3042_v10  ;;  %v805_v25 = vmax.f32 %v767_v22, 0.0  ;;  %v770_v26 = vadd.f32 %v2066_v23, %v3042_v10  ;;  %v797_v27 = vmax.f32 %v735_v19, 0.0 }
 0x1a3   : > { %v798_v28 = vmax.f32 %v738_v24, 0.0  ;;  %v2043_v29 = vpop.f32.mrb[4].mxu0  ;;  %v806_v31 = vmax.f32 %v770_v26, 0.0  ;;  %v2067_v32 = vpop.f32.mrb[4].mxu1 }
 0x1a4   : > { %v2044_v30 = vpop.f32.mrb[5].mxu0  ;;  %v2068_v36 = vpop.f32.mrb[5].mxu1 }
 0x1a5   : > { %v2045_v33 = vadd.f32 %v2044_v30, %v2043_v29  ;;  %v2046_v34 = vpop.f32.mrb[6].mxu0  ;;  %v813_v35 = vpack.c.bf16 %v798_v28, %v797_v27  ;;  %v2069_v38 = vadd.f32 %v2068_v36, %v2067_v32  ;;  %v2070_v39 = vpop.f32.mrb[6].mxu1  ;;  %v3048_v40 = vpack.c.bf16 %v806_v31, %v805_v25 }
 0x1a6   : > { %v2047_v37 = vpop.f32.mrb[7].mxu0  ;;  %v2071_v43 = vpop.f32.mrb[7].mxu1 }
 0x1a7   : > { %v743_v41 = vadd.f32 %v2045_v33, %v3042_v10  ;;  %v2048_v42 = vadd.f32 %v2047_v37, %v2046_v34  ;;  %2151 = vmatprep.mubr.bf16.mxu1 %v813_v35  ;;  %v775_v44 = vadd.f32 %v2069_v38, %v3042_v10  ;;  %v2072_v45 = vadd.f32 %v2071_v43, %v2070_v39  ;;  %v2374_v37 = vld [vmem:[%s3257_s5 + $0x18] sm:$0xff]   ;;  %v2375_v38 = vld [vmem:[#allocation8] sm:$0xff]   ;;  %v2376_v39 = vld [vmem:[#allocation8 + $0x8] sm:$0xff]  }
 0x1a8   : > { %2191 = vmatprep.subr.bf16.mxu0 %v2375_v38 }
 0x1a9   : > { %v746_v46 = vadd.f32 %v2048_v42, %v3042_v10  ;;  %v807_v47 = vmax.f32 %v775_v44, 0.0  ;;  %v778_v48 = vadd.f32 %v2072_v45, %v3042_v10  ;;  %v799_v49 = vmax.f32 %v743_v41, 0.0  ;;  %2192 = vmatpush3.bf16.msra.mxu0 %v2375_v38 }
 0x1aa   : > { %2193 = vmatprep.subr.bf16.mxu0 %v2376_v39 }
 0x1ab   : > { %v800_v50 = vmax.f32 %v746_v46, 0.0  ;;  %v2049_v51 = vpop.f32.mrb[8].mxu0  ;;  %v808_v53 = vmax.f32 %v778_v48, 0.0  ;;  %v2073_v54 = vpop.f32.mrb[8].mxu1 }
 0x1ac   : > { %v2050_v52 = vpop.f32.mrb[9].mxu0  ;;  %v2074_v58 = vpop.f32.mrb[9].mxu1 }
 0x1ad   : > { %v814_v55 = vpack.c.bf16 %v800_v50, %v799_v49  ;;  %v2051_v56 = vadd.f32 %v2050_v52, %v2049_v51  ;;  %v2052_v57 = vpop.f32.mrb[10].mxu0  ;;  %v2075_v61 = vadd.f32 %v2074_v58, %v2073_v54  ;;  %v2076_v62 = vpop.f32.mrb[10].mxu1  ;;  %v818_v63 = vpack.c.bf16 %v808_v53, %v807_v47  ;;  %2194 = vmatpush3.bf16.msra.mxu0 %v2376_v39 }
 0x1ae   : > { %v2053_v60 = vpop.f32.mrb[11].mxu0  ;;  %v2077_v2 = vpop.f32.mrb[11].mxu1 }
 0x1af   : > { %v751_v0 = vadd.f32 %v2051_v56, %v3042_v10  ;;  %v2054_v1 = vadd.f32 %v2053_v60, %v2052_v57  ;;  %2152 = vmatmul.mubr.bf16.vlgmr.msra.gmra.mrb[16].mxu1 %v814_v55  ;;  %v783_v3 = vadd.f32 %v2075_v61, %v3042_v10  ;;  %v2078_v4 = vadd.f32 %v2077_v2, %v2076_v62 }
 0x1b0   : > { %2168 = vmatpush3.bf16.msra.mxu1 %v3039_v8 }
 0x1b1   : > { %v754_v5 = vadd.f32 %v2054_v1, %v3042_v10  ;;  %2169 = vmatprep.subr.bf16.mxu1 %v2372_v59  ;;  %v809_v7 = vmax.f32 %v783_v3, 0.0  ;;  %v786_v9 = vadd.f32 %v2078_v4, %v3042_v10  ;;  %v801_v11 = vmax.f32 %v751_v0, 0.0 }
 0x1b3   : > { %v802_v12 = vmax.f32 %v754_v5, 0.0  ;;  %v2055_v13 = vpop.f32.mrb[12].mxu0  ;;  %v810_v15 = vmax.f32 %v786_v9, 0.0  ;;  %v2079_v16 = vpop.f32.mrb[12].mxu1 }
 0x1b4   : > { %v2056_v14 = vpop.f32.mrb[13].mxu0  ;;  %2170 = vmatpush3.bf16.msra.mxu1 %v2372_v59  ;;  %v2080_v19 = vpop.f32.mrb[13].mxu1 }
 0x1b5   : > { %v2057_v17 = vadd.f32 %v2056_v14, %v2055_v13  ;;  %v2058_v18 = vpop.f32.mrb[14].mxu0  ;;  %v815_v8 = vpack.c.bf16 %v802_v12, %v801_v11  ;;  %2171 = vmatprep.subr.bf16.mxu1 %v2373_v6  ;;  %v2081_v21 = vadd.f32 %v2080_v19, %v2079_v16  ;;  %v2082_v22 = vpop.f32.mrb[14].mxu1  ;;  %v819_v23 = vpack.c.bf16 %v810_v15, %v809_v7 }
 0x1b6   : > { %v2059_v20 = vpop.f32.mrb[15].mxu0  ;;  %v2083_v26 = vpop.f32.mrb[15].mxu1 }
 0x1b7   : > { %v759_v24 = vadd.f32 %v2057_v17, %v3042_v10  ;;  %v2060_v25 = vadd.f32 %v2059_v20, %v2058_v18  ;;  %2155 = vmatprep.mubr.bf16.mxu1 %v815_v8  ;;  %v791_v27 = vadd.f32 %v2081_v21, %v3042_v10  ;;  %v2084_v28 = vadd.f32 %v2083_v26, %v2082_v22 }
 0x1b8   : > { %2172 = vmatpush3.bf16.msra.mxu1 %v2373_v6 }
 0x1b9   : > { %v762_v29 = vadd.f32 %v2060_v25, %v3042_v10  ;;  %v811_v30 = vmax.f32 %v791_v27, 0.0  ;;  %v794_v31 = vadd.f32 %v2084_v28, %v3042_v10  ;;  %v803_v32 = vmax.f32 %v759_v24, 0.0  ;;  %2173 = vmatprep.subr.bf16.mxu1 %v2374_v37  ;;  %v1949_v10 = vld [vmem:[#allocation7] ss:$0 sm:$0xff] }
 0x1bb   : > { %v804_v33 = vmax.f32 %v762_v29, 0.0  ;;  %v812_v34 = vmax.f32 %v794_v31, 0.0 }
 0x1bc   : > { %2174 = vmatpush3.bf16.msra.mxu1 %v2374_v37  ;;  %v1958_v37 = vld [vmem:[%s3258_s6] ss:$0 sm:$0xff] }
 0x1bd   : > { %v816_v35 = vpack.c.bf16 %v804_v33, %v803_v32  ;;  %v820_v36 = vpack.c.bf16 %v812_v34, %v811_v30  ;;  %v2377_v33 = vld [vmem:[%s3261_s9] sm:$0xff]   ;;  %v2378_v34 = vld [vmem:[%s3261_s9 + $0x8] sm:$0xff]  }
 0x1be   : > { %2211 = vmatprep.subr.bf16.mxu1 %v2377_v33 }
 0x1bf   : > { %2156 = vmatmul.mubr.bf16.gmra.mrb[20].mxu1 %v816_v35  ;;  %v2379_v35 = vld [vmem:[%s3261_s9 + $0x10] sm:$0xff]  }
 0x1c0   : > { %2159 = vmatprep.mubr.bf16.mxu1 %v3048_v40 }
 0x1c7   : > { %2160 = vmatmul.mubr.bf16.gmra.mrb[24].mxu1 %v818_v63 }
 0x1c8   : > { %2163 = vmatprep.mubr.bf16.mxu1 %v819_v23 }
 0x1cf   : > { %2164 = vmatmul.mubr.bf16.gmra.mrb[28].mxu1 %v820_v36 }
 0x282   : > { %v2153_v41 = vpop.f32.mrb[16].mxu1 }
 0x283   : > { %v935_v42 = vadd.f32 %v2153_v41, %v1949_v10  ;;  %v926_v43 = vpop.f32.mrb[17].mxu1 }
 0x284   : > { %v927_v40 = vadd.f32 %v1949_v10, %v926_v43  ;;  %v2154_v44 = vpop.f32.mrb[18].mxu1 }
 0x285   : > { %v938_v45 = vadd.f32 %v2154_v44, %v1949_v10  ;;  %v929_v46 = vpop.f32.mrb[19].mxu1  ;;  %v991_v48 = vmax.f32 %v935_v42, 0.0 }
 0x286   : > { %v930_v47 = vadd.f32 %v1949_v10, %v929_v46  ;;  %v989_v50 = vmax.f32 %v927_v40, 0.0 }
 0x287   : > { %v992_v49 = vmax.f32 %v938_v45, 0.0 }
 0x288   : > { %v990_v51 = vmax.f32 %v930_v47, 0.0 }
 0x289   : > { %v1006_v52 = vpack.c.bf16 %v992_v49, %v991_v48 }
 0x28a   : > { %v1005_v53 = vpack.c.bf16 %v990_v51, %v989_v50 }
 0x28c   : > { %2175 = vmatprep.mubr.msk.bf16.mxu1 %vm1052_vm0, %v1005_v53 }
 0x28d   : > { %2176 = vmatmul.mubr.msk.bf16.vlgmr.msra.gmra.mrb[32].mxu1 %vm1052_vm0, %v1006_v52 }
 0x28e   : > { %2212 = vmatpush3.bf16.msra.mxu1 %v2377_v33 }
 0x28f   : > { %2213 = vmatprep.subr.bf16.mxu1 %v2378_v34 }
 0x292   : > { %v2157_v54 = vpop.f32.mrb[20].mxu1  ;;  %2214 = vmatpush3.bf16.msra.mxu1 %v2378_v34 }
 0x293   : > { %v951_v55 = vadd.f32 %v2157_v54, %v1949_v10  ;;  %v942_v56 = vpop.f32.mrb[21].mxu1  ;;  %2215 = vmatprep.subr.bf16.mxu1 %v2379_v35 }
 0x294   : > { %v943_v57 = vadd.f32 %v1949_v10, %v942_v56  ;;  %v2158_v58 = vpop.f32.mrb[22].mxu1 }
 0x295   : > { %v954_v59 = vadd.f32 %v2158_v58, %v1949_v10  ;;  %v945_v60 = vpop.f32.mrb[23].mxu1  ;;  %v995_v62 = vmax.f32 %v951_v55, 0.0 }
 0x296   : > { %v946_v61 = vadd.f32 %v1949_v10, %v945_v60  ;;  %v993_v0 = vmax.f32 %v943_v57, 0.0  ;;  %2216 = vmatpush3.bf16.msra.mxu1 %v2379_v35 }
 0x297   : > { %v996_v63 = vmax.f32 %v954_v59, 0.0 }
 0x298   : > { %v994_v1 = vmax.f32 %v946_v61, 0.0 }
 0x299   : > { %v1008_v2 = vpack.c.bf16 %v996_v63, %v995_v62 }
 0x29a   : > { %v1007_v3 = vpack.c.bf16 %v994_v1, %v993_v0  ;;  %v2161_v4 = vpop.f32.mrb[24].mxu1 }
 0x29b   : > { %v967_v5 = vadd.f32 %v2161_v4, %v1949_v10  ;;  %v958_v6 = vpop.f32.mrb[25].mxu1 }
 0x29c   : > { %v959_v7 = vadd.f32 %v1949_v10, %v958_v6  ;;  %v2162_v9 = vpop.f32.mrb[26].mxu1  ;;  %2179 = vmatprep.mubr.msk.bf16.mxu1 %vm1052_vm0, %v1007_v3 }
 0x29d   : > { %v999_v11 = vmax.f32 %v967_v5, 0.0  ;;  %v970_v12 = vadd.f32 %v2162_v9, %v1949_v10  ;;  %v961_v13 = vpop.f32.mrb[27].mxu1  ;;  %2180 = vmatmul.mubr.msk.bf16.gmra.mrb[36].mxu1 %vm1052_vm0, %v1008_v2 }
 0x29e   : > { %v997_v14 = vmax.f32 %v959_v7, 0.0  ;;  %v962_v15 = vadd.f32 %v1949_v10, %v961_v13 }
 0x29f   : > { %v1000_v16 = vmax.f32 %v970_v12, 0.0 }
 0x2a0   : > { %v998_v17 = vmax.f32 %v962_v15, 0.0  ;;  %v2381_v15 = vld [vmem:[#allocation10] ss:$8 sps:$4 sm:$0xff]  }
 0x2a1   : > { %v1010_v18 = vpack.c.bf16 %v1000_v16, %v999_v11  ;;  %v2383_v16 = vld [vmem:[#allocation10 + $0x4] ss:$8 sps:$4 sm:$0xff]  }
 0x2a2   : > { %v1009_v8 = vpack.c.bf16 %v998_v17, %v997_v14  ;;  %v2165_v19 = vpop.f32.mrb[28].mxu1  ;;  %v2380_v14 = vld [vmem:[%s3261_s9 + $0x18] sm:$0xff]   ;;  %v2386_v17 = vld [vmem:[#allocation10 + $0x14] ss:$8 sps:$4 sm:$0xff]   ;;  %1643 = vmatprep.subr.bf16.mxu0 %v2383_v16 }
 0x2a3   : > { %v983_v20 = vadd.f32 %v2165_v19, %v1949_v10  ;;  %v974_v21 = vpop.f32.mrb[29].mxu1  ;;  %2217 = vmatprep.subr.bf16.mxu1 %v2380_v14  ;;  %v2387_v19 = vld [vmem:[#allocation10 + $0x20] ss:$8 sps:$4 sm:$0xff]  }
 0x2a4   : > { %v975_v22 = vadd.f32 %v1949_v10, %v974_v21  ;;  %v2166_v23 = vpop.f32.mrb[30].mxu1  ;;  %2183 = vmatprep.mubr.msk.bf16.mxu1 %vm1052_vm0, %v1009_v8  ;;  %2218 = vmatpush3.bf16.msra.mxu1 %v2380_v14  ;;  %v2389_v8 = vld [vmem:[#allocation10 + $0x24] ss:$8 sps:$4 sm:$0xff]   ;;  %v2390_v21 = vld [vmem:[#allocation10 + $0x30] ss:$8 sps:$4 sm:$0xff]  }
 0x2a5   : > { %v1003_v24 = vmax.f32 %v983_v20, 0.0  ;;  %v986_v25 = vadd.f32 %v2166_v23, %v1949_v10  ;;  %v977_v26 = vpop.f32.mrb[31].mxu1  ;;  %2184 = vmatmul.mubr.msk.bf16.gmra.mrb[40].mxu1 %vm1052_vm0, %v1010_v18  ;;  %v2384_v18 = vld [vmem:[#allocation10 + $0x10] ss:$8 sps:$4 sm:$0xff]   ;;  %v2392_v20 = vld [vmem:[#allocation10 + $0x34] ss:$8 sps:$4 sm:$0xff]  }
 0x2a6   : > { %v1001_v27 = vmax.f32 %v975_v22, 0.0  ;;  %v978_v28 = vadd.f32 %v1949_v10, %v977_v26  ;;  %v2395_v22 = vld [vmem:[#allocation10 + $0x44] ss:$8 sps:$4 sm:$0xff]   ;;  %v2393_v23 = vld [vmem:[#allocation10 + $0x40] ss:$8 sps:$4 sm:$0xff]  }
 0x2a7   : > { %v1004_v29 = vmax.f32 %v986_v25, 0.0  ;;  %v2396_v25 = vld [vmem:[#allocation10 + $0x50] ss:$8 sps:$4 sm:$0xff]   ;;  %v1971_v26 = vld [vmem:[%s3260_s8] ss:$0 sm:$0xff] }
 0x2a8   : > { %v1002_v30 = vmax.f32 %v978_v28, 0.0 }
 0x2a9   : > { %v1012_v31 = vpack.c.bf16 %v1004_v29, %v1003_v24  ;;  %v2398_v24 = vld [vmem:[#allocation10 + $0x54] ss:$8 sps:$4 sm:$0xff]  }
 0x2aa   : > { %v1011_v32 = vpack.c.bf16 %v1002_v30, %v1001_v27 }
 0x2ac   : > { %2187 = vmatprep.mubr.msk.bf16.mxu1 %vm1052_vm0, %v1011_v32 }
 0x2ad   : > { %2188 = vmatmul.mubr.msk.bf16.gmra.mrb[44].mxu1 %vm1052_vm0, %v1012_v31 }
 0x360   : > { %v2177_v36 = vpop.f32.mrb[32].mxu1 }
 0x361   : > { %v1111_v38 = vpop.f32.mrb[33].mxu1  ;;  %v1120_v10 = vadd.f32 %v2177_v36, %v1958_v37 }
 0x362   : > { %v2178_v39 = vpop.f32.mrb[34].mxu1  ;;  %v1112_v43 = vadd.f32 %v1958_v37, %v1111_v38 }
 0x363   : > { %v1123_v41 = vadd.f32 %v2178_v39, %v1958_v37  ;;  %v1114_v42 = vpop.f32.mrb[35].mxu1 }
 0x364   : > { %v1115_v40 = vadd.f32 %v1958_v37, %v1114_v42 }
 0x365   : > { %v1175_v44 = vpack.c.bf16 %v1123_v41, %v1120_v10 }
 0x366   : > { %v1174_v45 = vpack.c.bf16 %v1115_v40, %v1112_v43 }
 0x368   : > { %2195 = vmatprep.mubr.msk.bf16.mxu0 %vm1205_vm1, %v1174_v45 }
 0x369   : > { %2196 = vmatmul.mubr.msk.bf16.vlgmr.msra.gmra.mrb[16].mxu0 %vm1205_vm1, %v1175_v44 }
 0x36a   : > { %1644 = vmatpush1.bf16.msra.mxu0 %v2381_v15 }
 0x36b   : > { %1645 = vmatprep.subr.bf16.mxu0 %v2386_v17 }
 0x36e   : > { %1646 = vmatpush1.bf16.msra.mxu0 %v2384_v18 }
 0x36f   : > { %1647 = vmatprep.subr.bf16.mxu0 %v2389_v8 }
 0x370   : > { %v2181_v46 = vpop.f32.mrb[36].mxu1 }
 0x371   : > { %v1127_v47 = vpop.f32.mrb[37].mxu1  ;;  %v1136_v49 = vadd.f32 %v2181_v46, %v1958_v37 }
 0x372   : > { %v2182_v48 = vpop.f32.mrb[38].mxu1  ;;  %v1128_v52 = vadd.f32 %v1958_v37, %v1127_v47  ;;  %1648 = vmatpush1.bf16.msra.mxu0 %v2387_v19  ;;  %v2401_v19 = vld [vmem:[#allocation10 + $0x64] ss:$8 sps:$4 sm:$0xff]  }
 0x373   : > { %v1139_v50 = vadd.f32 %v2182_v48, %v1958_v37  ;;  %v1130_v51 = vpop.f32.mrb[39].mxu1  ;;  %1649 = vmatprep.subr.bf16.mxu0 %v2392_v20  ;;  %v2399_v20 = vld [vmem:[#allocation10 + $0x60] ss:$8 sps:$4 sm:$0xff]  }
 0x374   : > { %v1131_v53 = vadd.f32 %v1958_v37, %v1130_v51 }
 0x375   : > { %v1177_v54 = vpack.c.bf16 %v1139_v50, %v1136_v49 }
 0x376   : > { %v1176_v55 = vpack.c.bf16 %v1131_v53, %v1128_v52  ;;  %1650 = vmatpush1.bf16.msra.mxu0 %v2390_v21  ;;  %v2404_v21 = vld [vmem:[#allocation10 + $0x74] ss:$8 sps:$4 sm:$0xff]  }
 0x377   : > { %1651 = vmatprep.subr.bf16.mxu0 %v2395_v22  ;;  %v2402_v22 = vld [vmem:[#allocation10 + $0x70] ss:$8 sps:$4 sm:$0xff]  }
 0x378   : > { %v2185_v56 = vpop.f32.mrb[40].mxu1  ;;  %2199 = vmatprep.mubr.msk.bf16.mxu0 %vm1205_vm1, %v1176_v55 }
 0x379   : > { %v1152_v57 = vadd.f32 %v2185_v56, %v1958_v37  ;;  %v1143_v58 = vpop.f32.mrb[41].mxu1  ;;  %2200 = vmatmul.mubr.msk.bf16.gmra.mrb[20].mxu0 %vm1205_vm1, %v1177_v54 }
 0x37a   : > { %v2186_v59 = vpop.f32.mrb[42].mxu1  ;;  %v1144_v62 = vadd.f32 %v1958_v37, %v1143_v58  ;;  %1652 = vmatpush1.bf16.msra.mxu0 %v2393_v23  ;;  %v2634_v23 = vmov 0  }
 0x37b   : > { %v1155_v60 = vadd.f32 %v2186_v59, %v1958_v37  ;;  %v1146_v61 = vpop.f32.mrb[43].mxu1  ;;  %1653 = vmatprep.subr.bf16.mxu0 %v2398_v24  ;;  %v1982_v24 = vld [vmem:[%s3293_s20] ss:$0 sm:$0xff]  ;;  %s2551_s20 = sshll.u32 %s2635_s23, 4  ;;  %s2552_s20 = int_to_ptr.vmem [resolvable:$false] %s2551_s20 }
 0x37c   : > { %v1147_v63 = vadd.f32 %v1958_v37, %v1146_v61  ;;  %s2553_s19 = scalar_lea.vmem %s2552_s20, 8192  ;;  %p2554_p3 = scmp.lt.s32.totalorder %s3204_s17, %s2552_s20 }
 0x37d   : > { %v1179_v0 = vpack.c.bf16 %v1155_v60, %v1152_v57  ;;  %p2555_p7 = scmp.lt.s32.totalorder %s2553_s19, %s2547_s16 }
 0x37e   : > { %v1178_v1 = vpack.c.bf16 %v1147_v63, %v1144_v62  ;;  %1654 = vmatpush1.bf16.msra.mxu0 %v2396_v25 }
 0x37f   : > { %1655 = vmatprep.subr.bf16.mxu0 %v2401_v19  ;;  %p2556_p10 = por %p2555_p7, %p2554_p3 }
 0x380   : > { %v2189_v2 = vpop.f32.mrb[44].mxu1  ;;  %2203 = vmatprep.mubr.msk.bf16.mxu0 %vm1205_vm1, %v1178_v1 }
 0x381   : > { %v1168_v3 = vadd.f32 %v2189_v2, %v1958_v37  ;;  %v1159_v4 = vpop.f32.mrb[45].mxu1  ;;  %2204 = vmatmul.mubr.msk.bf16.gmra.mrb[24].mxu0 %vm1205_vm1, %v1179_v0  ;;  %p2557_p13 = pnand %p2556_p10, %p2550_p8 }
 0x382   : > { %v1160_v5 = vadd.f32 %v1958_v37, %v1159_v4  ;;  %v2190_v6 = vpop.f32.mrb[46].mxu1  ;;  %1656 = vmatpush1.bf16.msra.mxu0 %v2399_v20  ;;  %v1551_v20 = vld [vmem:[%s3294_s14] sm:$0x3] }
 0x383   : > { %v1171_v7 = vadd.f32 %v2190_v6, %v1958_v37  ;;  %v1162_v9 = vpop.f32.mrb[47].mxu1  ;;  %1657 = vmatprep.subr.bf16.mxu0 %v2404_v21 }
 0x384   : > { %v1163_v11 = vadd.f32 %v1958_v37, %v1162_v9 }
 0x385   : > { %v1181_v12 = vpack.c.bf16 %v1171_v7, %v1168_v3 }
 0x386   : > { %v1180_v13 = vpack.c.bf16 %v1163_v11, %v1160_v5  ;;  %1658 = vmatpush1.bf16.msra.mxu0 %v2402_v22 }
 0x388   : > { %2207 = vmatprep.mubr.msk.bf16.mxu0 %vm1205_vm1, %v1180_v13 }
 0x389   : > { %2208 = vmatmul.mubr.msk.bf16.gmra.mrb[28].mxu0 %vm1205_vm1, %v1181_v12 }
 0x38a   : > { %1675 = vmatprep.mubr.bf16.mxu0 %v2634_v23 }
 0x43c   : > { %v2197_v27 = vpop.f32.mrb[16].mxu0 }
 0x43d   : > { %v1273_v28 = vadd.f32 %v2197_v27, %v1971_v26  ;;  %v1264_v29 = vpop.f32.mrb[17].mxu0 }
 0x43e   : > { %v1265_v30 = vadd.f32 %v1971_v26, %v1264_v29  ;;  %v2198_v31 = vpop.f32.mrb[18].mxu0 }
 0x43f   : > { %v1276_v32 = vadd.f32 %v2198_v31, %v1971_v26  ;;  %v1267_v33 = vpop.f32.mrb[19].mxu0  ;;  %v1329_v35 = vmax.f32 %v1273_v28, 0.0 }
 0x440   : > { %v1268_v34 = vadd.f32 %v1971_v26, %v1267_v33  ;;  %v1327_v37 = vmax.f32 %v1265_v30, 0.0 }
 0x441   : > { %v1330_v36 = vmax.f32 %v1276_v32, 0.0 }
 0x442   : > { %v1328_v38 = vmax.f32 %v1268_v34, 0.0 }
 0x443   : > { %v1344_v39 = vpack.c.bf16 %v1330_v36, %v1329_v35 }
 0x444   : > { %v1343_v10 = vpack.c.bf16 %v1328_v38, %v1327_v37 }
 0x446   : > { %2219 = vmatprep.mubr.msk.bf16.mxu1 %vm1052_vm0, %v1343_v10 }
 0x447   : > { %2220 = vmatmul.mubr.msk.bf16.vlgmr.msra.gmra.mrb[48].mxu1 %vm1052_vm0, %v1344_v39 }
 0x44c   : > { %v2201_v41 = vpop.f32.mrb[20].mxu0 }
 0x44d   : > { %v1289_v42 = vadd.f32 %v2201_v41, %v1971_v26  ;;  %v1280_v43 = vpop.f32.mrb[21].mxu0 }
 0x44e   : > { %v1281_v40 = vadd.f32 %v1971_v26, %v1280_v43  ;;  %v2202_v44 = vpop.f32.mrb[22].mxu0 }
 0x44f   : > { %v1292_v45 = vadd.f32 %v2202_v44, %v1971_v26  ;;  %v1283_v46 = vpop.f32.mrb[23].mxu0  ;;  %v1333_v48 = vmax.f32 %v1289_v42, 0.0 }
 0x450   : > { %v1284_v47 = vadd.f32 %v1971_v26, %v1283_v46  ;;  %v1331_v50 = vmax.f32 %v1281_v40, 0.0 }
 0x451   : > { %v1334_v49 = vmax.f32 %v1292_v45, 0.0 }
 0x452   : > { %v1332_v51 = vmax.f32 %v1284_v47, 0.0 }
 0x453   : > { %v1346_v52 = vpack.c.bf16 %v1334_v49, %v1333_v48 }
 0x454   : > { %v1345_v53 = vpack.c.bf16 %v1332_v51, %v1331_v50  ;;  %v2205_v54 = vpop.f32.mrb[24].mxu0 }
 0x455   : > { %v1305_v55 = vadd.f32 %v2205_v54, %v1971_v26  ;;  %v1296_v56 = vpop.f32.mrb[25].mxu0 }
 0x456   : > { %v1297_v57 = vadd.f32 %v1971_v26, %v1296_v56  ;;  %v2206_v58 = vpop.f32.mrb[26].mxu0  ;;  %2223 = vmatprep.mubr.msk.bf16.mxu1 %vm1052_vm0, %v1345_v53 }
 0x457   : > { %v1308_v59 = vadd.f32 %v2206_v58, %v1971_v26  ;;  %v1299_v60 = vpop.f32.mrb[27].mxu0  ;;  %2224 = vmatmul.mubr.msk.bf16.gmra.mrb[52].mxu1 %vm1052_vm0, %v1346_v52  ;;  %v1337_v62 = vmax.f32 %v1305_v55, 0.0 }
 0x458   : > { %v1300_v61 = vadd.f32 %v1971_v26, %v1299_v60  ;;  %v1335_v0 = vmax.f32 %v1297_v57, 0.0 }
 0x459   : > { %v1338_v63 = vmax.f32 %v1308_v59, 0.0 }
 0x45a   : > { %v1336_v1 = vmax.f32 %v1300_v61, 0.0 }
 0x45b   : > { %v1348_v2 = vpack.c.bf16 %v1338_v63, %v1337_v62 }
 0x45c   : > { %v1347_v3 = vpack.c.bf16 %v1336_v1, %v1335_v0  ;;  %v2209_v4 = vpop.f32.mrb[28].mxu0 }
 0x45d   : > { %v1321_v5 = vadd.f32 %v2209_v4, %v1971_v26  ;;  %v1312_v6 = vpop.f32.mrb[29].mxu0 }
 0x45e   : > { %v1313_v7 = vadd.f32 %v1971_v26, %v1312_v6  ;;  %v2210_v9 = vpop.f32.mrb[30].mxu0  ;;  %2227 = vmatprep.mubr.msk.bf16.mxu1 %vm1052_vm0, %v1347_v3 }
 0x45f   : > { %v1341_v11 = vmax.f32 %v1321_v5, 0.0  ;;  %v1324_v12 = vadd.f32 %v2210_v9, %v1971_v26  ;;  %v1315_v13 = vpop.f32.mrb[31].mxu0  ;;  %2228 = vmatmul.mubr.msk.bf16.gmra.mrb[56].mxu1 %vm1052_vm0, %v1348_v2 }
 0x460   : > { %v1339_v14 = vmax.f32 %v1313_v7, 0.0  ;;  %v1316_v15 = vadd.f32 %v1971_v26, %v1315_v13 }
 0x461   : > { %v1342_v16 = vmax.f32 %v1324_v12, 0.0 }
 0x462   : > { %v1340_v17 = vmax.f32 %v1316_v15, 0.0 }
 0x463   : > { %v1350_v18 = vpack.c.bf16 %v1342_v16, %v1341_v11 }
 0x464   : > { %v1349_v8 = vpack.c.bf16 %v1340_v17, %v1339_v14 }
 0x466   : > { %2231 = vmatprep.mubr.msk.bf16.mxu1 %vm1052_vm0, %v1349_v8 }
 0x467   : > { %2232 = vmatmul.mubr.msk.bf16.gmra.mrb[60].mxu1 %vm1052_vm0, %v1350_v18  ;;  %v1553_v18 = vlaneseq }
 0x469   : > { %v1554_v8 = vshrl.u32 %v1553_v18, 7 }
 0x46b   : > { %v1555_v19 = vsub.s32 0, %v1554_v8  ;;  %v1559_v21 = vsub.s32 1, %v1554_v8 }
 0x46d   : > { %v3129_v22 = vrot.slane %v1551_v20, %v1555_v19 }
 0x51a   : > { %v2221_v25 = vpop.f32.mrb[48].mxu1 }
 0x51b   : > { %v1457_v26 = vadd.f32 %v2221_v25, %v1982_v24  ;;  %v1448_v27 = vpop.f32.mrb[49].mxu1 }
 0x51c   : > { %v1449_v28 = vadd.f32 %v1982_v24, %v1448_v27  ;;  %v2222_v29 = vpop.f32.mrb[50].mxu1 }
 0x51d   : > { %v1460_v30 = vadd.f32 %v2222_v29, %v1982_v24  ;;  %v1451_v31 = vpop.f32.mrb[51].mxu1  ;;  %v1513_v33 = vmax.f32 %v1457_v26, 0.0 }
 0x51e   : > { %v1452_v32 = vadd.f32 %v1982_v24, %v1451_v31  ;;  %v1511_v35 = vmax.f32 %v1449_v28, 0.0 }
 0x51f   : > { %v1514_v34 = vmax.f32 %v1460_v30, 0.0 }
 0x520   : > { %v1512_v36 = vmax.f32 %v1452_v32, 0.0 }
 0x521   : > { %v1528_v37 = vpack.c.bf16 %v1514_v34, %v1513_v33 }
 0x522   : > { %v1527_v38 = vpack.c.bf16 %v1512_v36, %v1511_v35 }
 0x524   : > { %1676 = vmatmul.mubr.bf16.vlgmr.msra.gmra.mrb[32].mxu0 %v1527_v38 }
 0x525   : > { %1685 = vmatprep.mubr.bf16.mxu0 %v2634_v23 }
 0x52a   : > { %v2225_v39 = vpop.f32.mrb[52].mxu1 }
 0x52b   : > { %v1473_v10 = vadd.f32 %v2225_v39, %v1982_v24  ;;  %v1464_v41 = vpop.f32.mrb[53].mxu1 }
 0x52c   : > { %v1465_v42 = vadd.f32 %v1982_v24, %v1464_v41  ;;  %v2226_v43 = vpop.f32.mrb[54].mxu1  ;;  %1686 = vmatmul.mubr.bf16.gmra.mrb[36].mxu0 %v1528_v37 }
 0x52d   : > { %v1476_v40 = vadd.f32 %v2226_v43, %v1982_v24  ;;  %v1467_v44 = vpop.f32.mrb[55].mxu1  ;;  %1695 = vmatprep.mubr.bf16.mxu0 %v2634_v23  ;;  %v1517_v46 = vmax.f32 %v1473_v10, 0.0 }
 0x52e   : > { %v1468_v45 = vadd.f32 %v1982_v24, %v1467_v44  ;;  %v1515_v48 = vmax.f32 %v1465_v42, 0.0 }
 0x52f   : > { %v1518_v47 = vmax.f32 %v1476_v40, 0.0 }
 0x530   : > { %v1516_v49 = vmax.f32 %v1468_v45, 0.0 }
 0x531   : > { %v1530_v50 = vpack.c.bf16 %v1518_v47, %v1517_v46 }
 0x532   : > { %v1529_v51 = vpack.c.bf16 %v1516_v49, %v1515_v48  ;;  %v2229_v52 = vpop.f32.mrb[56].mxu1 }
 0x533   : > { %v1489_v53 = vadd.f32 %v2229_v52, %v1982_v24  ;;  %v1480_v54 = vpop.f32.mrb[57].mxu1 }
 0x534   : > { %v1481_v55 = vadd.f32 %v1982_v24, %v1480_v54  ;;  %v2230_v56 = vpop.f32.mrb[58].mxu1  ;;  %1696 = vmatmul.mubr.bf16.gmra.mrb[40].mxu0 %v1529_v51 }
 0x535   : > { %v1492_v57 = vadd.f32 %v2230_v56, %v1982_v24  ;;  %v1483_v58 = vpop.f32.mrb[59].mxu1  ;;  %1705 = vmatprep.mubr.bf16.mxu0 %v2634_v23  ;;  %v1521_v60 = vmax.f32 %v1489_v53, 0.0 }
 0x536   : > { %v1484_v59 = vadd.f32 %v1982_v24, %v1483_v58  ;;  %v1519_v62 = vmax.f32 %v1481_v55, 0.0 }
 0x537   : > { %v1522_v61 = vmax.f32 %v1492_v57, 0.0 }
 0x538   : > { %v1520_v63 = vmax.f32 %v1484_v59, 0.0 }
 0x539   : > { %v1532_v0 = vpack.c.bf16 %v1522_v61, %v1521_v60 }
 0x53a   : > { %v1531_v1 = vpack.c.bf16 %v1520_v63, %v1519_v62  ;;  %v2233_v2 = vpop.f32.mrb[60].mxu1 }
 0x53b   : > { %v1505_v3 = vadd.f32 %v2233_v2, %v1982_v24  ;;  %v1496_v4 = vpop.f32.mrb[61].mxu1 }
 0x53c   : > { %v1497_v5 = vadd.f32 %v1982_v24, %v1496_v4  ;;  %v2234_v6 = vpop.f32.mrb[62].mxu1  ;;  %1706 = vmatmul.mubr.bf16.gmra.mrb[44].mxu0 %v1530_v50 }
 0x53d   : > { %v1525_v7 = vmax.f32 %v1505_v3, 0.0  ;;  %v1508_v9 = vadd.f32 %v2234_v6, %v1982_v24  ;;  %v1499_v11 = vpop.f32.mrb[63].mxu1  ;;  %1715 = vmatprep.mubr.bf16.mxu0 %v2634_v23 }
 0x53e   : > { %v1500_v12 = vadd.f32 %v1982_v24, %v1499_v11  ;;  %v1523_v14 = vmax.f32 %v1497_v5, 0.0  ;;  %v3131_v24 = vrot.slane %v1551_v20, %v1559_v21 }
 0x53f   : > { %v1526_v13 = vmax.f32 %v1508_v9, 0.0 }
 0x540   : > { %v1524_v15 = vmax.f32 %v1500_v12, 0.0 }
 0x541   : > { %v1534_v16 = vpack.c.bf16 %v1526_v13, %v1525_v7 }
 0x542   : > { %v1533_v17 = vpack.c.bf16 %v1524_v15, %v1523_v14 }
 0x544   : > { %1716 = vmatmul.mubr.bf16.gmra.mrb[48].mxu0 %v1531_v1 }
 0x545   : > { %1725 = vmatprep.mubr.bf16.mxu0 %v2634_v23 }
 0x54c   : > { %1726 = vmatmul.mubr.bf16.gmra.mrb[52].mxu0 %v1532_v0 }
 0x54d   : > { %1735 = vmatprep.mubr.bf16.mxu0 %v2634_v23 }
 0x554   : > { %1736 = vmatmul.mubr.bf16.gmra.mrb[56].mxu0 %v1533_v17 }
 0x555   : > { %1745 = vmatprep.mubr.bf16.mxu0 %v2634_v23 }
 0x55c   : > { %1746 = vmatmul.mubr.bf16.gmra.mrb[60].mxu0 %v1534_v16 }
 0x5f7   : > { %v1677_v25 = vpop.f32.mrb[32].mxu0 }
 0x5f8   : > { %v1678_v26 = vadd.f32 %v1677_v25, %v3129_v22  ;;  %v1679_v27 = vpop.f32.mrb[33].mxu0 }
 0x5f9   : > { %v1680_v28 = vadd.f32 %v1679_v27, %v3131_v24  ;;  %v1681_v23 = vpop.f32.mrb[34].mxu0 }
 0x5fa   : > { %1756 = vst [vmem:[%s3137_s12] sm:$0xff] %v1678_v26  ;;  %v1682_v29 = vadd.f32 %v1681_v23, %v3129_v22  ;;  %v1683_v30 = vpop.f32.mrb[35].mxu0 }
 0x5fb   : > { %1757 = vst [vmem:[%s3137_s12 + $0x8] sm:$0xff] %v1680_v28  ;;  %v1684_v31 = vadd.f32 %v1683_v30, %v3131_v24 }
 0x5fc   : > { %1758 = vst [vmem:[%s3137_s12 + $0x10] sm:$0xff] %v1682_v29 }
 0x5fd   : > { %1759 = vst [vmem:[%s3137_s12 + $0x18] sm:$0xff] %v1684_v31 }
 0x5ff   : > { %v1687_v32 = vpop.f32.mrb[36].mxu0 }
 0x600   : > { %v1688_v33 = vadd.f32 %v1687_v32, %v3129_v22  ;;  %v1689_v34 = vpop.f32.mrb[37].mxu0 }
 0x601   : > { %v1690_v35 = vadd.f32 %v1689_v34, %v3131_v24  ;;  %v1691_v36 = vpop.f32.mrb[38].mxu0 }
 0x602   : > { %1760 = vst [vmem:[%s3137_s12 + $0x20] sm:$0xff] %v1688_v33  ;;  %v1692_v37 = vadd.f32 %v1691_v36, %v3129_v22  ;;  %v1693_v38 = vpop.f32.mrb[39].mxu0 }
 0x603   : > { %1761 = vst [vmem:[%s3137_s12 + $0x28] sm:$0xff] %v1690_v35  ;;  %v1694_v39 = vadd.f32 %v1693_v38, %v3131_v24 }
 0x604   : > { %1762 = vst [vmem:[%s3137_s12 + $0x30] sm:$0xff] %v1692_v37 }
 0x605   : > { %1763 = vst [vmem:[%s3137_s12 + $0x38] sm:$0xff] %v1694_v39 }
 0x607   : > { %v1697_v10 = vpop.f32.mrb[40].mxu0 }
 0x608   : > { %v1698_v41 = vadd.f32 %v1697_v10, %v3129_v22  ;;  %v1699_v42 = vpop.f32.mrb[41].mxu0 }
 0x609   : > { %v1700_v43 = vadd.f32 %v1699_v42, %v3131_v24  ;;  %v1701_v40 = vpop.f32.mrb[42].mxu0 }
 0x60a   : > { %1764 = vst [vmem:[%s3137_s12 + $0x40] sm:$0xff] %v1698_v41  ;;  %v1702_v44 = vadd.f32 %v1701_v40, %v3129_v22  ;;  %v1703_v45 = vpop.f32.mrb[43].mxu0 }
 0x60b   : > { %1765 = vst [vmem:[%s3137_s12 + $0x48] sm:$0xff] %v1700_v43  ;;  %v1704_v46 = vadd.f32 %v1703_v45, %v3131_v24 }
 0x60c   : > { %1766 = vst [vmem:[%s3137_s12 + $0x50] sm:$0xff] %v1702_v44 }
 0x60d   : > { %1767 = vst [vmem:[%s3137_s12 + $0x58] sm:$0xff] %v1704_v46 }
 0x60f   : > { %v1707_v47 = vpop.f32.mrb[44].mxu0 }
 0x610   : > { %v1708_v48 = vadd.f32 %v1707_v47, %v3129_v22  ;;  %v1709_v49 = vpop.f32.mrb[45].mxu0 }
 0x611   : > { %v1710_v50 = vadd.f32 %v1709_v49, %v3131_v24  ;;  %v1711_v51 = vpop.f32.mrb[46].mxu0 }
 0x612   : > { %1768 = vst [vmem:[%s3137_s12 + $0x60] sm:$0xff] %v1708_v48  ;;  %v1712_v52 = vadd.f32 %v1711_v51, %v3129_v22  ;;  %v1713_v53 = vpop.f32.mrb[47].mxu0 }
 0x613   : > { %1769 = vst [vmem:[%s3137_s12 + $0x68] sm:$0xff] %v1710_v50  ;;  %v1714_v54 = vadd.f32 %v1713_v53, %v3131_v24 }
 0x614   : > { %1770 = vst [vmem:[%s3137_s12 + $0x70] sm:$0xff] %v1712_v52 }
 0x615   : > { %1771 = vst [vmem:[%s3137_s12 + $0x78] sm:$0xff] %v1714_v54 }
 0x617   : > { %v1717_v55 = vpop.f32.mrb[48].mxu0 }
 0x618   : > { %v1718_v56 = vadd.f32 %v1717_v55, %v3129_v22  ;;  %v1719_v57 = vpop.f32.mrb[49].mxu0 }
 0x619   : > { %v1720_v58 = vadd.f32 %v1719_v57, %v3131_v24  ;;  %v1721_v59 = vpop.f32.mrb[50].mxu0 }
 0x61a   : > { %1772 = vst [vmem:[%s3137_s12 + $0x80] sm:$0xff] %v1718_v56  ;;  %v1722_v60 = vadd.f32 %v1721_v59, %v3129_v22  ;;  %v1723_v61 = vpop.f32.mrb[51].mxu0 }
 0x61b   : > { %1773 = vst [vmem:[%s3137_s12 + $0x88] sm:$0xff] %v1720_v58  ;;  %v1724_v62 = vadd.f32 %v1723_v61, %v3131_v24 }
 0x61c   : > { %1774 = vst [vmem:[%s3137_s12 + $0x90] sm:$0xff] %v1722_v60 }
 0x61d   : > { %1775 = vst [vmem:[%s3137_s12 + $0x98] sm:$0xff] %v1724_v62 }
 0x61f   : > { %v1727_v63 = vpop.f32.mrb[52].mxu0 }
 0x620   : > { %v1728_v0 = vadd.f32 %v1727_v63, %v3129_v22  ;;  %v1729_v1 = vpop.f32.mrb[53].mxu0 }
 0x621   : > { %v1730_v2 = vadd.f32 %v1729_v1, %v3131_v24  ;;  %v1731_v3 = vpop.f32.mrb[54].mxu0 }
 0x622   : > { %1776 = vst [vmem:[%s3137_s12 + $0xa0] sm:$0xff] %v1728_v0  ;;  %v1732_v4 = vadd.f32 %v1731_v3, %v3129_v22  ;;  %v1733_v5 = vpop.f32.mrb[55].mxu0 }
 0x623   : > { %1777 = vst [vmem:[%s3137_s12 + $0xa8] sm:$0xff] %v1730_v2  ;;  %v1734_v6 = vadd.f32 %v1733_v5, %v3131_v24 }
 0x624   : > { %1778 = vst [vmem:[%s3137_s12 + $0xb0] sm:$0xff] %v1732_v4 }
 0x625   : > { %1779 = vst [vmem:[%s3137_s12 + $0xb8] sm:$0xff] %v1734_v6 }
 0x627   : > { %v1737_v7 = vpop.f32.mrb[56].mxu0 }
 0x628   : > { %v1738_v9 = vadd.f32 %v1737_v7, %v3129_v22  ;;  %v1739_v11 = vpop.f32.mrb[57].mxu0 }
 0x629   : > { %v1740_v12 = vadd.f32 %v1739_v11, %v3131_v24  ;;  %v1741_v13 = vpop.f32.mrb[58].mxu0 }
 0x62a   : > { %1780 = vst [vmem:[%s3137_s12 + $0xc0] sm:$0xff] %v1738_v9  ;;  %v1742_v14 = vadd.f32 %v1741_v13, %v3129_v22  ;;  %v1743_v15 = vpop.f32.mrb[59].mxu0 }
 0x62b   : > { %1781 = vst [vmem:[%s3137_s12 + $0xc8] sm:$0xff] %v1740_v12  ;;  %v1744_v16 = vadd.f32 %v1743_v15, %v3131_v24 }
 0x62c   : > { %1782 = vst [vmem:[%s3137_s12 + $0xd0] sm:$0xff] %v1742_v14 }
 0x62d   : > { %1783 = vst [vmem:[%s3137_s12 + $0xd8] sm:$0xff] %v1744_v16 }
 0x62f   : > { %v1747_v17 = vpop.f32.mrb[60].mxu0 }
 0x630   : > { %v1748_v18 = vadd.f32 %v1747_v17, %v3129_v22  ;;  %v1749_v8 = vpop.f32.mrb[61].mxu0 }
 0x631   : > { %v1750_v19 = vadd.f32 %v1749_v8, %v3131_v24  ;;  %v1751_v20 = vpop.f32.mrb[62].mxu0 }
 0x632   : > { %1784 = vst [vmem:[%s3137_s12 + $0xe0] sm:$0xff] %v1748_v18  ;;  %v1752_v21 = vadd.f32 %v1751_v20, %v3129_v22  ;;  %v1753_v25 = vpop.f32.mrb[63].mxu0 }
 0x633   : > { %1785 = vst [vmem:[%s3137_s12 + $0xe8] sm:$0xff] %v1750_v19  ;;  %v1754_v26 = vadd.f32 %v1753_v25, %v3131_v24 }
 0x634   : > { %1786 = vst [vmem:[%s3137_s12 + $0xf0] sm:$0xff] %v1752_v21 }
 0x635   : > { %1787 = vst [vmem:[%s3137_s12 + $0xf8] sm:$0xff] %v1754_v26 }
 0x636   : > { %2560 = shalt.err (!%p2557_p13)
}
 0x637   : > { %s2561_s10 = scalar_lea.hbm %s3202_s21, 4096  ;;  %s2565_s15 = scalar_lea.hbm %s3295_s30, 8192 }
 0x638   : > { %p2562_p0 = scmp.ne.s32.totalorder %s3202_s21, %s2561_s10  ;;  %p2566_p9 = scmp.lt.u32.totalorder %s3202_s21, %s3295_s30 }
 0x639   : > { %p2567_p12 = scmp.lt.u32.totalorder %s2565_s15, %s2561_s10  ;;  %p2569_p1 = scmp.lt.u32.totalorder %s2561_s10, %s3202_s21 }
 0x63a   : > { %p2563_p5 = pnand %p2562_p0, %p2863_p4 }
 0x63b   : > { %p2568_p2 = por %p2567_p12, %p2566_p9 }
 0x63c   : > { %p2564_p11 = pneg %p2563_p5 }
 0x63d   : > { %p2570_p6 = por %p2569_p1, %p2568_p2 }
 0x63f   : > { %p2571_p8 = pnand %p2570_p6, %p2564_p11 }
 0x641   : > { %2574 = shalt.err (!%p2571_p8)
}
 0x642   : > { %s2636_s16 = smov 256   ;;  %s2637_s23 = smov 16  }
 0x643   : > { %2269 = dma.vmem_to_hbm [thread:$0]  (%p2863_p4), %s3204_s17, 4096, %s3202_s21, %s1789_s29, %s2636_s16, %s2636_s16, %s2637_s23  }
 0x644 PF: > { %s3296_s20 = sld [smem:[#allocation16_spill]]  ;;  %s3297_s19 = sld [smem:[#allocation17_spill]] }
 0x645   : > { %p3299_p7 = scmp.ge.s32.totalorder %s2621_s28, 2 }
 0x64a   : > { %s1818_s14 = sand.u32 1, %s3296_s20   ;;  %p3298_p3 = scmp.ne.s32.totalorder %s3297_s19, 0 }
 0x64b   : > { %s1819_s10 = scalar_lea.sflag [#allocation4], %s1818_s14 }
 0x64c   : > { %p2289_p10 = pnand %p3299_p7, %p3298_p3 }
 0x64e   : > { %2604 = dma.done.wait (!%p2289_p10), %s1819_s10, 4096  }
 0x64f   : > { %2606 = vsyncadd (!%p2289_p10), %s1819_s10, 4294963200  ;;  %p28_p13 = scmp.ge.s32.totalorder %s2850_s2, 4   ;;  %s3300_s25 = smov %s2613_s26 }
 0x650   : > { %s3301_s26 = smov %s2617_s27  ;;  %s3302_s27 = smov %s2859_s22 }
 0x651   : > { %s3303_s28 = smov %s2850_s2  ;;  %30 = sbr.rel (!%p28_p13) target bundleno = 12 (0xc), region = 133 }
 0x658   :  { %1824 = vsyncpa [#allocation3], 1 }
 0x659   :  { %1826 = vsyncpa [#allocation3 + $0x1], 1 }
 0x65a   :  { %1827 = vsyncpa [#allocation6], 1 }
 0x65b   :  { %1828 = vsyncpa [#allocation9], 1 }
 0x65c   :  { %1829 = vsyncpa [#allocation4], 1 }
 0x65d   :  { %1831 = vsyncpa [#allocation4 + $0x1], 1 }

</bundles_post_ra>
